<compile_context>
chip_gen: v6e
topology: v6e:2x2x1
jax: 0.10.0
libtpu: 0.0.40
codegen_flags: <defaults>
</compile_context>

<pallas_src>
import math

import jax
import jax.numpy as jnp
from jax.experimental import pallas as pl
from jax.experimental.pallas import tpu as pltpu

EPS = 1e-5


# ---------------------------------------------------------------------------
# Weight preparation: fold the 3x3 kernel's dx taps (and W zero-padding) into
# three (W*Cin, W*Cout) block-Toeplitz matrices, one per dy.
# ---------------------------------------------------------------------------
def _toeplitz_weights(w_hwio, W):
    """w_hwio: (3, 3, Cin, Cout) -> (3, W*Cin, W*Cout) block-Toeplitz."""
    mats = []
    for dy in range(3):
        t = None
        for dx in range(3):
            # nonzero at (w_in, w_out) with w_in - w_out = dx - 1
            sel = jnp.eye(W, W, k=1 - dx, dtype=w_hwio.dtype)
            blk = jnp.kron(sel, w_hwio[dy, dx])
            t = blk if t is None else t + blk
        mats.append(t)
    return jnp.stack(mats, axis=0)


# ---------------------------------------------------------------------------
# Conv pass kernels (lane-dense, row-block grid, optional fused BN1+ReLU).
# ---------------------------------------------------------------------------
def _make_conv_kernel(TB, WC, fused):
    def compute(c_ref, u_ref, d_ref, sc_ref, sh_ref, w_ref, out_ref, stat_ref):
        i = pl.program_id(1)
        last = pl.num_programs(1) - 1

        def pre(v):  # fused BN1 affine + ReLU (pass 2 only)
            if fused:
                return jnp.maximum(v * sc_ref[...] + sh_ref[...], 0.0)
            return v

        center = pre(c_ref[0])                                     # (TB, WC)
        # 1-row H halo from the neighbouring row blocks of the same sample;
        # sample boundaries (top/bottom) are zero-padded via where().
        row_up = jnp.where(i > 0, pre(u_ref[0, TB - 1:TB, :]), 0.0)   # (1, WC)
        row_dn = jnp.where(i < last, pre(d_ref[0, 0:1, :]), 0.0)      # (1, WC)

        slab_up = jnp.concatenate([row_up, center[:TB - 1, :]], axis=0)
        slab_dn = jnp.concatenate([center[1:, :], row_dn], axis=0)

        # conv3x3 == three lane-dense matmuls against block-Toeplitz weights.
        acc = jnp.dot(slab_up, w_ref[0], preferred_element_type=jnp.float32)
        acc = acc + jnp.dot(center, w_ref[1], preferred_element_type=jnp.float32)
        acc = acc + jnp.dot(slab_dn, w_ref[2], preferred_element_type=jnp.float32)

        out_ref[0] = acc
        # Lane-dense per-block BN partials (sum, sumsq reduced over rows only).
        stats = jnp.concatenate(
            [jnp.sum(acc, axis=0, keepdims=True),
             jnp.sum(acc * acc, axis=0, keepdims=True)], axis=0)     # (2, WC)
        stat_ref[0, 0] = stats

    if fused:
        def kernel(c_ref, u_ref, d_ref, sc_ref, sh_ref, w_ref, out_ref, stat_ref):
            compute(c_ref, u_ref, d_ref, sc_ref, sh_ref, w_ref, out_ref, stat_ref)
    else:
        def kernel(c_ref, u_ref, d_ref, w_ref, out_ref, stat_ref):
            compute(c_ref, u_ref, d_ref, None, None, w_ref, out_ref, stat_ref)
    return kernel


def _pick_tb(H, N):
    """Largest row-block that still gives >= 4 grid steps (sublane aligned)."""
    for cand in (128, 64, 32, 16, 8):
        if cand <= H and H % cand == 0 and N * (H // cand) >= 4:
            return cand
    return 8 if H % 8 == 0 else H


def _pick_tr(R, L):
    """Epilogue row tile: largest with >= 4 steps and modest VMEM footprint."""
    for cand in (512, 256, 128, 64, 32, 16, 8):
        if R % cand == 0 and R // cand >= 4 and cand * L * 4 <= 4 * 1024 * 1024:
            return cand
    return 8 if R % 8 == 0 else R


def _conv_pass(act, tw, scale_wc, shift_wc, TB):
    """act: (N, H, WC) f32; tw: (3, WC, WC); optional fused BN1 scale/shift."""
    N, H, WC = act.shape
    nH = H // TB
    fused = scale_wc is not None

    act_spec = pl.BlockSpec((1, TB, WC), lambda n, i: (n, i, 0))
    up_spec = pl.BlockSpec((1, TB, WC),
                           lambda n, i: (n, jnp.maximum(i - 1, 0), 0))
    dn_spec = pl.BlockSpec((1, TB, WC),
                           lambda n, i: (n, jnp.minimum(i + 1, nH - 1), 0))
    w_spec = pl.BlockSpec((3, WC, WC), lambda n, i: (0, 0, 0))
    vec_spec = pl.BlockSpec((1, WC), lambda n, i: (0, 0))

    if fused:
        inputs = (act, act, act, scale_wc, shift_wc, tw)
        in_specs = [act_spec, up_spec, dn_spec, vec_spec, vec_spec, w_spec]
    else:
        inputs = (act, act, act, tw)
        in_specs = [act_spec, up_spec, dn_spec, w_spec]

    kernel = _make_conv_kernel(TB, WC, fused)

    flops = 2 * N * H * 3 * WC * WC + 3 * N * H * WC    # matmuls + BN/ReLU VPU
    bytes_accessed = 4 * (3 * N * H * WC               # act read (center+halos)
                          + 3 * WC * WC                # Toeplitz weights
                          + 2 * WC                     # scale/shift
                          + N * H * WC                 # conv output write
                          + N * nH * 2 * WC)           # stats write

    return pl.pallas_call(
        kernel,
        grid=(N, nH),
        in_specs=in_specs,
        out_specs=(
            pl.BlockSpec((1, TB, WC), lambda n, i: (n, i, 0)),
            pl.BlockSpec((1, 1, 2, WC), lambda n, i: (n, i, 0, 0)),
        ),
        out_shape=(
            jax.ShapeDtypeStruct((N, H, WC), jnp.float32),
            jax.ShapeDtypeStruct((N, nH, 2, WC), jnp.float32),
        ),
        compiler_params=pltpu.CompilerParams(
            dimension_semantics=("parallel", "parallel"),
        ),
        cost_estimate=pl.CostEstimate(
            flops=flops, transcendentals=0, bytes_accessed=bytes_accessed),
    )(*inputs)


# ---------------------------------------------------------------------------
# BN partial-stats reduction (tiny, done in plain JAX between passes).
# ---------------------------------------------------------------------------
def _bn_scale_shift(stat, gamma, beta, count, W, C):
    """stat: (N, nH, 2, W*C) partials -> lane-dense (1, W*C) scale/shift."""
    s = jnp.sum(stat, axis=(0, 1))                 # (2, WC)
    s = s.reshape(2, W, C).sum(axis=1)             # (2, C)
    mean = s[0] / count
    var = jnp.maximum(s[1] / count - mean * mean, 0.0)   # biased batch var
    scale = gamma.reshape(-1) * jax.lax.rsqrt(var + EPS)
    shift = beta.reshape(-1) - mean * scale
    scale_wc = jnp.tile(scale, (W,)).reshape(1, W * C)
    shift_wc = jnp.tile(shift, (W,)).reshape(1, W * C)
    return scale_wc, shift_wc


# ---------------------------------------------------------------------------
# Pass 3: lane-dense BN2 affine + identity residual + ReLU.
# ---------------------------------------------------------------------------
def _epilogue_kernel(y_ref, x_ref, sc_ref, sh_ref, o_ref):
    o_ref[...] = jnp.maximum(
        y_ref[...] * sc_ref[...] + sh_ref[...] + x_ref[...], 0.0)


def _epilogue(y2d, x2d, scale_wc, shift_wc):
    R, L = y2d.shape
    TR = _pick_tr(R, L)
    return pl.pallas_call(
        _epilogue_kernel,
        grid=(R // TR,),
        in_specs=[
            pl.BlockSpec((TR, L), lambda i: (i, 0)),
            pl.BlockSpec((TR, L), lambda i: (i, 0)),
            pl.BlockSpec((1, L), lambda i: (0, 0)),
            pl.BlockSpec((1, L), lambda i: (0, 0)),
        ],
        out_specs=pl.BlockSpec((TR, L), lambda i: (i, 0)),
        out_shape=jax.ShapeDtypeStruct((R, L), jnp.float32),
        compiler_params=pltpu.CompilerParams(
            dimension_semantics=("parallel",)),
        cost_estimate=pl.CostEstimate(
            flops=3 * R * L, transcendentals=0,
            bytes_accessed=4 * (3 * R * L + 2 * L)),
    )(y2d, x2d, scale_wc, shift_wc)


# ---------------------------------------------------------------------------
# Full BasicBlock forward.
# ---------------------------------------------------------------------------
def basic_block_forward(x_nchw, w1, g1, b1, w2, g2, b2):
    """x: (N, C, H, W) f32; w*: (3,3,C,C) HWIO; g*/b*: (1, C). Returns NCHW."""
    N, C, H, W = x_nchw.shape
    WC = W * C
    x = jnp.transpose(x_nchw, (0, 2, 3, 1)).astype(jnp.float32).reshape(N, H, WC)

    t1 = _toeplitz_weights(w1.astype(jnp.float32), W)   # (3, WC, WC)
    t2 = _toeplitz_weights(w2.astype(jnp.float32), W)
    TB = _pick_tb(H, N)

    # Pass 1: conv1 + BN1 partial stats.
    conv1_raw, stat1 = _conv_pass(x, t1, None, None, TB)
    sc1, sh1 = _bn_scale_shift(stat1, g1, b1, N * H * W, W, C)

    # Pass 2: fused BN1 affine + ReLU + conv2 + BN2 partial stats.
    conv2_raw, stat2 = _conv_pass(conv1_raw, t2, sc1, sh1, TB)
    sc2, sh2 = _bn_scale_shift(stat2, g2, b2, N * H * W, W, C)

    # Pass 3: lane-dense BN2 affine + residual + ReLU on the (N*H, W*C) view.
    R = N * H
    out2d = _epilogue(conv2_raw.reshape(R, WC), x.reshape(R, WC), sc2, sh2)

    out = out2d.reshape(N, H, W, C)
    return jnp.transpose(out, (0, 3, 1, 2))


# ---------------------------------------------------------------------------
# Pure-JAX reference mirroring the PyTorch BasicBlock forward (train-mode BN).
# ---------------------------------------------------------------------------
def reference_forward(x_nchw, w1, g1, b1, w2, g2, b2):
    x = jnp.transpose(x_nchw, (0, 2, 3, 1))
    dn = ('NHWC', 'HWIO', 'NHWC')

    def conv(v, w):
        return jax.lax.conv_general_dilated(v, w, (1, 1), 'SAME',
                                            dimension_numbers=dn)

    def bn(v, g, b):
        m = jnp.mean(v, axis=(0, 1, 2))
        var = jnp.mean((v - m) ** 2, axis=(0, 1, 2))
        return (v - m) * (g.reshape(-1) * jax.lax.rsqrt(var + EPS)) + b.reshape(-1)

    out = jnp.maximum(bn(conv(x, w1), g1, b1), 0.0)
    out = bn(conv(out, w2), g2, b2)
    out = jnp.maximum(out + x, 0.0)
    return jnp.transpose(out, (0, 3, 1, 2))


if __name__ == "__main__":
    N, C, H, W = 2, 8, 16, 16   # inplanes = planes = 8, stride = 1 (W*C = 128)

    key = jax.random.PRNGKey(0)
    kx, kw1, kg1, kb1, kw2, kg2, kb2 = jax.random.split(key, 7)

    wscale = 1.0 / math.sqrt(9 * C)
    x = jax.random.normal(kx, (N, C, H, W), jnp.float32)
    w1 = jax.random.normal(kw1, (3, 3, C, C), jnp.float32) * wscale
    w2 = jax.random.normal(kw2, (3, 3, C, C), jnp.float32) * wscale
    g1 = 1.0 + 0.1 * jax.random.normal(kg1, (1, C), jnp.float32)
    b1 = 0.1 * jax.random.normal(kb1, (1, C), jnp.float32)
    g2 = 1.0 + 0.1 * jax.random.normal(kg2, (1, C), jnp.float32)
    b2 = 0.1 * jax.random.normal(kb2, (1, C), jnp.float32)

    fwd = jax.jit(basic_block_forward)
    out = jax.block_until_ready(fwd(x, w1, g1, b1, w2, g2, b2))

    ref = reference_forward(x, w1, g1, b1, w2, g2, b2)
    assert out.shape == (N, C, H, W)
    max_err = float(jnp.max(jnp.abs(out - ref)))
    assert jnp.allclose(out, ref, atol=1e-3, rtol=1e-3), max_err

    print("KERNEL_OK")
</pallas_src>

<mosaic_0001>
module attributes {stable_mosaic.version = 11 : i64} {
  func.func @kernel(%arg0: i32, %arg1: i32, %arg2: memref<1x8x128xf32, #tpu.memory_space<vmem>>, %arg3: memref<1x8x128xf32, #tpu.memory_space<vmem>>, %arg4: memref<1x8x128xf32, #tpu.memory_space<vmem>>, %arg5: memref<3x128x128xf32, #tpu.memory_space<vmem>>, %arg6: memref<1x8x128xf32, #tpu.memory_space<vmem>>, %arg7: memref<1x1x2x128xf32, #tpu.memory_space<vmem>>) attributes {dimension_semantics = [#tpu.dimension_semantics<parallel>, #tpu.dimension_semantics<parallel>], iteration_bounds = array<i64: 2, 2>, scalar_prefetch = 0 : i64, scratch_operands = 0 : i64, tpu.core_type = #tpu.core_type<tc>, window_params = [{transform_indices = @transform_0, window_bounds = array<i64: 1, 8, 128>}, {transform_indices = @transform_1, window_bounds = array<i64: 1, 8, 128>}, {transform_indices = @transform_2, window_bounds = array<i64: 1, 8, 128>}, {pipeline_mode = #tpu.pipeline_mode<synchronous>, transform_indices = @transform_3, window_bounds = array<i64: 3, 128, 128>}, {transform_indices = @transform_4, window_bounds = array<i64: 1, 8, 128>}, {transform_indices = @transform_5, window_bounds = array<i64: 1, 1, 2, 128>}]} {
    %c0 = arith.constant 0 : index
    %c0_0 = arith.constant 0 : index
    %c0_1 = arith.constant 0 : index
    %0 = vector.load %arg2[%c0, %c0_0, %c0_1] : memref<1x8x128xf32, #tpu.memory_space<vmem>>, vector<1x8x128xf32>
    %1 = vector.shape_cast %0 : vector<1x8x128xf32> to vector<8x128xf32>
    %c0_i32 = arith.constant 0 : i32
    %2 = arith.cmpi sgt, %arg1, %c0_i32 : i32
    %c0_2 = arith.constant 0 : index
    %c7 = arith.constant 7 : index
    %c0_3 = arith.constant 0 : index
    %3 = vector.load %arg3[%c0_2, %c7, %c0_3] : memref<1x8x128xf32, #tpu.memory_space<vmem>>, vector<1x1x128xf32>
    %4 = vector.shape_cast %3 : vector<1x1x128xf32> to vector<1x128xf32>
    %cst = arith.constant 0.000000e+00 : f32
    %5 = vector.broadcast %cst : f32 to vector<1x128xf32>
    %6 = arith.select %2, %4, %5 : vector<1x128xf32>
    %c1_i32 = arith.constant 1 : i32
    %7 = arith.cmpi slt, %arg1, %c1_i32 : i32
    %c0_4 = arith.constant 0 : index
    %c0_5 = arith.constant 0 : index
    %c0_6 = arith.constant 0 : index
    %8 = vector.load %arg4[%c0_4, %c0_5, %c0_6] : memref<1x8x128xf32, #tpu.memory_space<vmem>>, vector<1x1x128xf32>
    %9 = vector.shape_cast %8 : vector<1x1x128xf32> to vector<1x128xf32>
    %cst_7 = arith.constant 0.000000e+00 : f32
    %10 = vector.broadcast %cst_7 : f32 to vector<1x128xf32>
    %11 = arith.select %7, %9, %10 : vector<1x128xf32>
    %12 = vector.extract_strided_slice %1 {offsets = [0, 0], sizes = [7, 128], strides = [1, 1]} : vector<8x128xf32> to vector<7x128xf32>
    %13 = tpu.concatenate %6, %12 in 0 : vector<1x128xf32>, vector<7x128xf32> -> vector<8x128xf32>
    %14 = vector.extract_strided_slice %1 {offsets = [1, 0], sizes = [7, 128], strides = [1, 1]} : vector<8x128xf32> to vector<7x128xf32>
    %15 = tpu.concatenate %14, %11 in 0 : vector<7x128xf32>, vector<1x128xf32> -> vector<8x128xf32>
    %c0_8 = arith.constant 0 : index
    %c0_9 = arith.constant 0 : index
    %c0_10 = arith.constant 0 : index
    %16 = vector.load %arg5[%c0_8, %c0_9, %c0_10] : memref<3x128x128xf32, #tpu.memory_space<vmem>>, vector<1x128x128xf32>
    %17 = vector.shape_cast %16 : vector<1x128x128xf32> to vector<128x128xf32>
    %cst_11 = arith.constant dense<0.000000e+00> : vector<8x128xf32>
    %18 = tpu.matmul %13, %17, %cst_11 {dimension_numbers = #tpu.dot_dimension_numbers<[1], [0], [0], [1], [0, 0, 1, 1], [], []>} : vector<8x128xf32>, vector<128x128xf32>, vector<8x128xf32> -> vector<8x128xf32>
    %c1 = arith.constant 1 : index
    %c0_12 = arith.constant 0 : index
    %c0_13 = arith.constant 0 : index
    %19 = vector.load %arg5[%c1, %c0_12, %c0_13] : memref<3x128x128xf32, #tpu.memory_space<vmem>>, vector<1x128x128xf32>
    %20 = vector.shape_cast %19 : vector<1x128x128xf32> to vector<128x128xf32>
    %cst_14 = arith.constant dense<0.000000e+00> : vector<8x128xf32>
    %21 = tpu.matmul %1, %20, %cst_14 {dimension_numbers = #tpu.dot_dimension_numbers<[1], [0], [0], [1], [0, 0, 1, 1], [], []>} : vector<8x128xf32>, vector<128x128xf32>, vector<8x128xf32> -> vector<8x128xf32>
    %22 = arith.addf %18, %21 : vector<8x128xf32>
    %c2 = arith.constant 2 : index
    %c0_15 = arith.constant 0 : index
    %c0_16 = arith.constant 0 : index
    %23 = vector.load %arg5[%c2, %c0_15, %c0_16] : memref<3x128x128xf32, #tpu.memory_space<vmem>>, vector<1x128x128xf32>
    %24 = vector.shape_cast %23 : vector<1x128x128xf32> to vector<128x128xf32>
    %cst_17 = arith.constant dense<0.000000e+00> : vector<8x128xf32>
    %25 = tpu.matmul %15, %24, %cst_17 {dimension_numbers = #tpu.dot_dimension_numbers<[1], [0], [0], [1], [0, 0, 1, 1], [], []>} : vector<8x128xf32>, vector<128x128xf32>, vector<8x128xf32> -> vector<8x128xf32>
    %26 = arith.addf %22, %25 : vector<8x128xf32>
    %c0_18 = arith.constant 0 : index
    %c0_19 = arith.constant 0 : index
    %c0_20 = arith.constant 0 : index
    %27 = vector.load %arg6[%c0_18, %c0_19, %c0_20] : memref<1x8x128xf32, #tpu.memory_space<vmem>>, vector<1x8x128xf32>
    %28 = vector.shape_cast %27 : vector<1x8x128xf32> to vector<8x128xf32>
    %29 = vector.shape_cast %26 : vector<8x128xf32> to vector<1x8x128xf32>
    tpu.vector_store %arg6[%c0_18, %c0_19, %c0_20], %29 {strides = array<i32>} : memref<1x8x128xf32, #tpu.memory_space<vmem>>, vector<1x8x128xf32>,
    %cst_21 = arith.constant dense<0.000000e+00> : vector<128xf32>
    %30 = vector.multi_reduction <add>, %26, %cst_21 [0] : vector<8x128xf32> to vector<128xf32>
    %31 = vector.shape_cast %30 : vector<128xf32> to vector<1x128xf32>
    %32 = arith.mulf %26, %26 : vector<8x128xf32>
    %cst_22 = arith.constant dense<0.000000e+00> : vector<128xf32>
    %33 = vector.multi_reduction <add>, %32, %cst_22 [0] : vector<8x128xf32> to vector<128xf32>
    %34 = vector.shape_cast %33 : vector<128xf32> to vector<1x128xf32>
    %35 = tpu.concatenate %31, %34 in 0 : vector<1x128xf32>, vector<1x128xf32> -> vector<2x128xf32>
    %c0_23 = arith.constant 0 : index
    %c0_24 = arith.constant 0 : index
    %c0_25 = arith.constant 0 : index
    %c0_26 = arith.constant 0 : index
    %36 = vector.load %arg7[%c0_23, %c0_24, %c0_25, %c0_26] : memref<1x1x2x128xf32, #tpu.memory_space<vmem>>, vector<1x1x2x128xf32>
    %37 = vector.shape_cast %36 : vector<1x1x2x128xf32> to vector<2x128xf32>
    %38 = vector.shape_cast %35 : vector<2x128xf32> to vector<1x1x2x128xf32>
    tpu.vector_store %arg7[%c0_23, %c0_24, %c0_25, %c0_26], %38 {strides = array<i32>} : memref<1x1x2x128xf32, #tpu.memory_space<vmem>>, vector<1x1x2x128xf32>,
    return
  }
  func.func @transform_0(%arg0: i32, %arg1: i32) -> (i32, i32, i32) {
    %c0_i32 = arith.constant 0 : i32
    %c0_i32_0 = arith.constant 0 : i32
    return %arg0, %arg1, %c0_i32 : i32, i32, i32
  }
  func.func @transform_1(%arg0: i32, %arg1: i32) -> (i32, i32, i32) {
    %c1_i32 = arith.constant 1 : i32
    %0 = arith.subi %arg1, %c1_i32 : i32
    %c0_i32 = arith.constant 0 : i32
    %1 = arith.maxsi %0, %c0_i32 : i32
    %c0_i32_0 = arith.constant 0 : i32
    %c0_i32_1 = arith.constant 0 : i32
    return %arg0, %1, %c0_i32_0 : i32, i32, i32
  }
  func.func @transform_2(%arg0: i32, %arg1: i32) -> (i32, i32, i32) {
    %c1_i32 = arith.constant 1 : i32
    %0 = arith.addi %arg1, %c1_i32 : i32
    %c1_i32_0 = arith.constant 1 : i32
    %1 = arith.minsi %0, %c1_i32_0 : i32
    %c0_i32 = arith.constant 0 : i32
    %c0_i32_1 = arith.constant 0 : i32
    return %arg0, %1, %c0_i32 : i32, i32, i32
  }
  func.func @transform_3(%arg0: i32, %arg1: i32) -> (i32, i32, i32) {
    %c0_i32 = arith.constant 0 : i32
    %c0_i32_0 = arith.constant 0 : i32
    %c0_i32_1 = arith.constant 0 : i32
    %c0_i32_2 = arith.constant 0 : i32
    return %c0_i32, %c0_i32_0, %c0_i32_1 : i32, i32, i32
  }
  func.func @transform_4(%arg0: i32, %arg1: i32) -> (i32, i32, i32) {
    %c0_i32 = arith.constant 0 : i32
    %c0_i32_0 = arith.constant 0 : i32
    return %arg0, %arg1, %c0_i32 : i32, i32, i32
  }
  func.func @transform_5(%arg0: i32, %arg1: i32) -> (i32, i32, i32, i32) {
    %c0_i32 = arith.constant 0 : i32
    %c0_i32_0 = arith.constant 0 : i32
    %c0_i32_1 = arith.constant 0 : i32
    return %arg0, %arg1, %c0_i32, %c0_i32_0 : i32, i32, i32, i32
  }
}

module attributes {stable_mosaic.version = 11 : i64} {
  func.func @kernel(%arg0: i32, %arg1: i32, %arg2: memref<1x8x128xf32, #tpu.memory_space<vmem>>, %arg3: memref<1x8x128xf32, #tpu.memory_space<vmem>>, %arg4: memref<1x8x128xf32, #tpu.memory_space<vmem>>, %arg5: memref<1x128xf32, #tpu.memory_space<vmem>>, %arg6: memref<1x128xf32, #tpu.memory_space<vmem>>, %arg7: memref<3x128x128xf32, #tpu.memory_space<vmem>>, %arg8: memref<1x8x128xf32, #tpu.memory_space<vmem>>, %arg9: memref<1x1x2x128xf32, #tpu.memory_space<vmem>>) attributes {dimension_semantics = [#tpu.dimension_semantics<parallel>, #tpu.dimension_semantics<parallel>], iteration_bounds = array<i64: 2, 2>, scalar_prefetch = 0 : i64, scratch_operands = 0 : i64, tpu.core_type = #tpu.core_type<tc>, window_params = [{transform_indices = @transform_0, window_bounds = array<i64: 1, 8, 128>}, {transform_indices = @transform_1, window_bounds = array<i64: 1, 8, 128>}, {transform_indices = @transform_2, window_bounds = array<i64: 1, 8, 128>}, {pipeline_mode = #tpu.pipeline_mode<synchronous>, transform_indices = @transform_3, window_bounds = array<i64: 1, 128>}, {pipeline_mode = #tpu.pipeline_mode<synchronous>, transform_indices = @transform_4, window_bounds = array<i64: 1, 128>}, {pipeline_mode = #tpu.pipeline_mode<synchronous>, transform_indices = @transform_5, window_bounds = array<i64: 3, 128, 128>}, {transform_indices = @transform_6, window_bounds = array<i64: 1, 8, 128>}, {transform_indices = @transform_7, window_bounds = array<i64: 1, 1, 2, 128>}]} {
    %c0 = arith.constant 0 : index
    %c0_0 = arith.constant 0 : index
    %c0_1 = arith.constant 0 : index
    %0 = vector.load %arg2[%c0, %c0_0, %c0_1] : memref<1x8x128xf32, #tpu.memory_space<vmem>>, vector<1x8x128xf32>
    %1 = vector.shape_cast %0 : vector<1x8x128xf32> to vector<8x128xf32>
    %c0_2 = arith.constant 0 : index
    %c0_3 = arith.constant 0 : index
    %2 = vector.load %arg5[%c0_2, %c0_3] : memref<1x128xf32, #tpu.memory_space<vmem>>, vector<1x128xf32>
    %3 = vector.broadcast %2 : vector<1x128xf32> to vector<8x128xf32>
    %4 = arith.mulf %1, %3 : vector<8x128xf32>
    %c0_4 = arith.constant 0 : index
    %c0_5 = arith.constant 0 : index
    %5 = vector.load %arg6[%c0_4, %c0_5] : memref<1x128xf32, #tpu.memory_space<vmem>>, vector<1x128xf32>
    %6 = vector.broadcast %5 : vector<1x128xf32> to vector<8x128xf32>
    %7 = arith.addf %4, %6 : vector<8x128xf32>
    %cst = arith.constant 0.000000e+00 : f32
    %8 = vector.broadcast %cst : f32 to vector<8x128xf32>
    %9 = arith.maximumf %7, %8 : vector<8x128xf32>
    %c0_i32 = arith.constant 0 : i32
    %10 = arith.cmpi sgt, %arg1, %c0_i32 : i32
    %c0_6 = arith.constant 0 : index
    %c7 = arith.constant 7 : index
    %c0_7 = arith.constant 0 : index
    %11 = vector.load %arg3[%c0_6, %c7, %c0_7] : memref<1x8x128xf32, #tpu.memory_space<vmem>>, vector<1x1x128xf32>
    %12 = vector.shape_cast %11 : vector<1x1x128xf32> to vector<1x128xf32>
    %c0_8 = arith.constant 0 : index
    %c0_9 = arith.constant 0 : index
    %13 = vector.load %arg5[%c0_8, %c0_9] : memref<1x128xf32, #tpu.memory_space<vmem>>, vector<1x128xf32>
    %14 = arith.mulf %12, %13 : vector<1x128xf32>
    %c0_10 = arith.constant 0 : index
    %c0_11 = arith.constant 0 : index
    %15 = vector.load %arg6[%c0_10, %c0_11] : memref<1x128xf32, #tpu.memory_space<vmem>>, vector<1x128xf32>
    %16 = arith.addf %14, %15 : vector<1x128xf32>
    %cst_12 = arith.constant 0.000000e+00 : f32
    %17 = vector.broadcast %cst_12 : f32 to vector<1x128xf32>
    %18 = arith.maximumf %16, %17 : vector<1x128xf32>
    %cst_13 = arith.constant 0.000000e+00 : f32
    %19 = vector.broadcast %cst_13 : f32 to vector<1x128xf32>
    %20 = arith.select %10, %18, %19 : vector<1x128xf32>
    %c1_i32 = arith.constant 1 : i32
    %21 = arith.cmpi slt, %arg1, %c1_i32 : i32
    %c0_14 = arith.constant 0 : index
    %c0_15 = arith.constant 0 : index
    %c0_16 = arith.constant 0 : index
    %22 = vector.load %arg4[%c0_14, %c0_15, %c0_16] : memref<1x8x128xf32, #tpu.memory_space<vmem>>, vector<1x1x128xf32>
    %23 = vector.shape_cast %22 : vector<1x1x128xf32> to vector<1x128xf32>
    %c0_17 = arith.constant 0 : index
    %c0_18 = arith.constant 0 : index
    %24 = vector.load %arg5[%c0_17, %c0_18] : memref<1x128xf32, #tpu.memory_space<vmem>>, vector<1x128xf32>
    %25 = arith.mulf %23, %24 : vector<1x128xf32>
    %c0_19 = arith.constant 0 : index
    %c0_20 = arith.constant 0 : index
    %26 = vector.load %arg6[%c0_19, %c0_20] : memref<1x128xf32, #tpu.memory_space<vmem>>, vector<1x128xf32>
    %27 = arith.addf %25, %26 : vector<1x128xf32>
    %cst_21 = arith.constant 0.000000e+00 : f32
    %28 = vector.broadcast %cst_21 : f32 to vector<1x128xf32>
    %29 = arith.maximumf %27, %28 : vector<1x128xf32>
    %cst_22 = arith.constant 0.000000e+00 : f32
    %30 = vector.broadcast %cst_22 : f32 to vector<1x128xf32>
    %31 = arith.select %21, %29, %30 : vector<1x128xf32>
    %32 = vector.extract_strided_slice %9 {offsets = [0, 0], sizes = [7, 128], strides = [1, 1]} : vector<8x128xf32> to vector<7x128xf32>
    %33 = tpu.concatenate %20, %32 in 0 : vector<1x128xf32>, vector<7x128xf32> -> vector<8x128xf32>
    %34 = vector.extract_strided_slice %9 {offsets = [1, 0], sizes = [7, 128], strides = [1, 1]} : vector<8x128xf32> to vector<7x128xf32>
    %35 = tpu.concatenate %34, %31 in 0 : vector<7x128xf32>, vector<1x128xf32> -> vector<8x128xf32>
    %c0_23 = arith.constant 0 : index
    %c0_24 = arith.constant 0 : index
    %c0_25 = arith.constant 0 : index
    %36 = vector.load %arg7[%c0_23, %c0_24, %c0_25] : memref<3x128x128xf32, #tpu.memory_space<vmem>>, vector<1x128x128xf32>
    %37 = vector.shape_cast %36 : vector<1x128x128xf32> to vector<128x128xf32>
    %cst_26 = arith.constant dense<0.000000e+00> : vector<8x128xf32>
    %38 = tpu.matmul %33, %37, %cst_26 {dimension_numbers = #tpu.dot_dimension_numbers<[1], [0], [0], [1], [0, 0, 1, 1], [], []>} : vector<8x128xf32>, vector<128x128xf32>, vector<8x128xf32> -> vector<8x128xf32>
    %c1 = arith.constant 1 : index
    %c0_27 = arith.constant 0 : index
    %c0_28 = arith.constant 0 : index
    %39 = vector.load %arg7[%c1, %c0_27, %c0_28] : memref<3x128x128xf32, #tpu.memory_space<vmem>>, vector<1x128x128xf32>
    %40 = vector.shape_cast %39 : vector<1x128x128xf32> to vector<128x128xf32>
    %cst_29 = arith.constant dense<0.000000e+00> : vector<8x128xf32>
    %41 = tpu.matmul %9, %40, %cst_29 {dimension_numbers = #tpu.dot_dimension_numbers<[1], [0], [0], [1], [0, 0, 1, 1], [], []>} : vector<8x128xf32>, vector<128x128xf32>, vector<8x128xf32> -> vector<8x128xf32>
    %42 = arith.addf %38, %41 : vector<8x128xf32>
    %c2 = arith.constant 2 : index
    %c0_30 = arith.constant 0 : index
    %c0_31 = arith.constant 0 : index
    %43 = vector.load %arg7[%c2, %c0_30, %c0_31] : memref<3x128x128xf32, #tpu.memory_space<vmem>>, vector<1x128x128xf32>
    %44 = vector.shape_cast %43 : vector<1x128x128xf32> to vector<128x128xf32>
    %cst_32 = arith.constant dense<0.000000e+00> : vector<8x128xf32>
    %45 = tpu.matmul %35, %44, %cst_32 {dimension_numbers = #tpu.dot_dimension_numbers<[1], [0], [0], [1], [0, 0, 1, 1], [], []>} : vector<8x128xf32>, vector<128x128xf32>, vector<8x128xf32> -> vector<8x128xf32>
    %46 = arith.addf %42, %45 : vector<8x128xf32>
    %c0_33 = arith.constant 0 : index
    %c0_34 = arith.constant 0 : index
    %c0_35 = arith.constant 0 : index
    %47 = vector.load %arg8[%c0_33, %c0_34, %c0_35] : memref<1x8x128xf32, #tpu.memory_space<vmem>>, vector<1x8x128xf32>
    %48 = vector.shape_cast %47 : vector<1x8x128xf32> to vector<8x128xf32>
    %49 = vector.shape_cast %46 : vector<8x128xf32> to vector<1x8x128xf32>
    tpu.vector_store %arg8[%c0_33, %c0_34, %c0_35], %49 {strides = array<i32>} : memref<1x8x128xf32, #tpu.memory_space<vmem>>, vector<1x8x128xf32>,
    %cst_36 = arith.constant dense<0.000000e+00> : vector<128xf32>
    %50 = vector.multi_reduction <add>, %46, %cst_36 [0] : vector<8x128xf32> to vector<128xf32>
    %51 = vector.shape_cast %50 : vector<128xf32> to vector<1x128xf32>
    %52 = arith.mulf %46, %46 : vector<8x128xf32>
    %cst_37 = arith.constant dense<0.000000e+00> : vector<128xf32>
    %53 = vector.multi_reduction <add>, %52, %cst_37 [0] : vector<8x128xf32> to vector<128xf32>
    %54 = vector.shape_cast %53 : vector<128xf32> to vector<1x128xf32>
    %55 = tpu.concatenate %51, %54 in 0 : vector<1x128xf32>, vector<1x128xf32> -> vector<2x128xf32>
    %c0_38 = arith.constant 0 : index
    %c0_39 = arith.constant 0 : index
    %c0_40 = arith.constant 0 : index
    %c0_41 = arith.constant 0 : index
    %56 = vector.load %arg9[%c0_38, %c0_39, %c0_40, %c0_41] : memref<1x1x2x128xf32, #tpu.memory_space<vmem>>, vector<1x1x2x128xf32>
    %57 = vector.shape_cast %56 : vector<1x1x2x128xf32> to vector<2x128xf32>
    %58 = vector.shape_cast %55 : vector<2x128xf32> to vector<1x1x2x128xf32>
    tpu.vector_store %arg9[%c0_38, %c0_39, %c0_40, %c0_41], %58 {strides = array<i32>} : memref<1x1x2x128xf32, #tpu.memory_space<vmem>>, vector<1x1x2x128xf32>,
    return
  }
  func.func @transform_0(%arg0: i32, %arg1: i32) -> (i32, i32, i32) {
    %c0_i32 = arith.constant 0 : i32
    %c0_i32_0 = arith.constant 0 : i32
    return %arg0, %arg1, %c0_i32 : i32, i32, i32
  }
  func.func @transform_1(%arg0: i32, %arg1: i32) -> (i32, i32, i32) {
    %c1_i32 = arith.constant 1 : i32
    %0 = arith.subi %arg1, %c1_i32 : i32
    %c0_i32 = arith.constant 0 : i32
    %1 = arith.maxsi %0, %c0_i32 : i32
    %c0_i32_0 = arith.constant 0 : i32
    %c0_i32_1 = arith.constant 0 : i32
    return %arg0, %1, %c0_i32_0 : i32, i32, i32
  }
  func.func @transform_2(%arg0: i32, %arg1: i32) -> (i32, i32, i32) {
    %c1_i32 = arith.constant 1 : i32
    %0 = arith.addi %arg1, %c1_i32 : i32
    %c1_i32_0 = arith.constant 1 : i32
    %1 = arith.minsi %0, %c1_i32_0 : i32
    %c0_i32 = arith.constant 0 : i32
    %c0_i32_1 = arith.constant 0 : i32
    return %arg0, %1, %c0_i32 : i32, i32, i32
  }
  func.func @transform_3(%arg0: i32, %arg1: i32) -> (i32, i32) {
    %c0_i32 = arith.constant 0 : i32
    %c0_i32_0 = arith.constant 0 : i32
    %c0_i32_1 = arith.constant 0 : i32
    return %c0_i32, %c0_i32_0 : i32, i32
  }
  func.func @transform_4(%arg0: i32, %arg1: i32) -> (i32, i32) {
    %c0_i32 = arith.constant 0 : i32
    %c0_i32_0 = arith.constant 0 : i32
    %c0_i32_1 = arith.constant 0 : i32
    return %c0_i32, %c0_i32_0 : i32, i32
  }
  func.func @transform_5(%arg0: i32, %arg1: i32) -> (i32, i32, i32) {
    %c0_i32 = arith.constant 0 : i32
    %c0_i32_0 = arith.constant 0 : i32
    %c0_i32_1 = arith.constant 0 : i32
    %c0_i32_2 = arith.constant 0 : i32
    return %c0_i32, %c0_i32_0, %c0_i32_1 : i32, i32, i32
  }
  func.func @transform_6(%arg0: i32, %arg1: i32) -> (i32, i32, i32) {
    %c0_i32 = arith.constant 0 : i32
    %c0_i32_0 = arith.constant 0 : i32
    return %arg0, %arg1, %c0_i32 : i32, i32, i32
  }
  func.func @transform_7(%arg0: i32, %arg1: i32) -> (i32, i32, i32, i32) {
    %c0_i32 = arith.constant 0 : i32
    %c0_i32_0 = arith.constant 0 : i32
    %c0_i32_1 = arith.constant 0 : i32
    return %arg0, %arg1, %c0_i32, %c0_i32_0 : i32, i32, i32, i32
  }
}

module attributes {stable_mosaic.version = 11 : i64} {
  func.func @_epilogue_kernel(%arg0: i32, %arg1: memref<8x128xf32, #tpu.memory_space<vmem>>, %arg2: memref<8x128xf32, #tpu.memory_space<vmem>>, %arg3: memref<1x128xf32, #tpu.memory_space<vmem>>, %arg4: memref<1x128xf32, #tpu.memory_space<vmem>>, %arg5: memref<8x128xf32, #tpu.memory_space<vmem>>) attributes {dimension_semantics = [#tpu.dimension_semantics<parallel>], iteration_bounds = array<i64: 4>, scalar_prefetch = 0 : i64, scratch_operands = 0 : i64, tpu.core_type = #tpu.core_type<tc>, window_params = [{transform_indices = @transform_0, window_bounds = array<i64: 8, 128>}, {transform_indices = @transform_1, window_bounds = array<i64: 8, 128>}, {pipeline_mode = #tpu.pipeline_mode<synchronous>, transform_indices = @transform_2, window_bounds = array<i64: 1, 128>}, {pipeline_mode = #tpu.pipeline_mode<synchronous>, transform_indices = @transform_3, window_bounds = array<i64: 1, 128>}, {transform_indices = @transform_4, window_bounds = array<i64: 8, 128>}]} {
    %c0 = arith.constant 0 : index
    %c0_0 = arith.constant 0 : index
    %0 = vector.load %arg1[%c0, %c0_0] : memref<8x128xf32, #tpu.memory_space<vmem>>, vector<8x128xf32>
    %c0_1 = arith.constant 0 : index
    %c0_2 = arith.constant 0 : index
    %1 = vector.load %arg3[%c0_1, %c0_2] : memref<1x128xf32, #tpu.memory_space<vmem>>, vector<1x128xf32>
    %2 = vector.broadcast %1 : vector<1x128xf32> to vector<8x128xf32>
    %3 = arith.mulf %0, %2 : vector<8x128xf32>
    %c0_3 = arith.constant 0 : index
    %c0_4 = arith.constant 0 : index
    %4 = vector.load %arg4[%c0_3, %c0_4] : memref<1x128xf32, #tpu.memory_space<vmem>>, vector<1x128xf32>
    %5 = vector.broadcast %4 : vector<1x128xf32> to vector<8x128xf32>
    %6 = arith.addf %3, %5 : vector<8x128xf32>
    %c0_5 = arith.constant 0 : index
    %c0_6 = arith.constant 0 : index
    %7 = vector.load %arg2[%c0_5, %c0_6] : memref<8x128xf32, #tpu.memory_space<vmem>>, vector<8x128xf32>
    %8 = arith.addf %6, %7 : vector<8x128xf32>
    %cst = arith.constant 0.000000e+00 : f32
    %9 = vector.broadcast %cst : f32 to vector<8x128xf32>
    %10 = arith.maximumf %8, %9 : vector<8x128xf32>
    %c0_7 = arith.constant 0 : index
    %c0_8 = arith.constant 0 : index
    %11 = vector.load %arg5[%c0_7, %c0_8] : memref<8x128xf32, #tpu.memory_space<vmem>>, vector<8x128xf32>
    tpu.vector_store %arg5[%c0_7, %c0_8], %10 {strides = array<i32>} : memref<8x128xf32, #tpu.memory_space<vmem>>, vector<8x128xf32>,
    return
  }
  func.func @transform_0(%arg0: i32) -> (i32, i32) {
    %c0_i32 = arith.constant 0 : i32
    %c0_i32_0 = arith.constant 0 : i32
    return %arg0, %c0_i32 : i32, i32
  }
  func.func @transform_1(%arg0: i32) -> (i32, i32) {
    %c0_i32 = arith.constant 0 : i32
    %c0_i32_0 = arith.constant 0 : i32
    return %arg0, %c0_i32 : i32, i32
  }
  func.func @transform_2(%arg0: i32) -> (i32, i32) {
    %c0_i32 = arith.constant 0 : i32
    %c0_i32_0 = arith.constant 0 : i32
    %c0_i32_1 = arith.constant 0 : i32
    return %c0_i32, %c0_i32_0 : i32, i32
  }
  func.func @transform_3(%arg0: i32) -> (i32, i32) {
    %c0_i32 = arith.constant 0 : i32
    %c0_i32_0 = arith.constant 0 : i32
    %c0_i32_1 = arith.constant 0 : i32
    return %c0_i32, %c0_i32_0 : i32, i32
  }
  func.func @transform_4(%arg0: i32) -> (i32, i32) {
    %c0_i32 = arith.constant 0 : i32
    %c0_i32_0 = arith.constant 0 : i32
    return %arg0, %c0_i32 : i32, i32
  }
}

</mosaic_0001>

<bundles_post_ra>
// kernel: basic_block_forward.3
= control target key start
LH: loop header
LB: loop body
LE: loop exit
PB: predicated region body
PF: predicated region fallthrough
CT: control target
= control target key end

     0   :  { %s1184_s18 = smov 0   ;;  %s1186_s19 = smov 0   ;;  %s1500_s0 = inlined_call_operand.vmem [shape: f32[2,16,128], index: 0, kind: input, shape index: {}, may-alias: {0,1,2}]   ;;  %s1501_s1 = inlined_call_operand.vmem [shape: f32[2,16,128], index: 1, kind: input, shape index: {}, may-alias: {0,1,2}]   ;;  %s1502_s2 = inlined_call_operand.vmem [shape: f32[2,16,128], index: 2, kind: input, shape index: {}, may-alias: {0,1,2}]   ;;  %s1503_s3 = inlined_call_operand.vmem [shape: f32[3,128,128], index: 3, kind: input, shape index: {}]   ;;  %s1504_s4 = inlined_call_operand.vmem [shape: f32[2,16,128], index: 4, kind: output, shape index: {0}]   ;;  %s1505_s5 = inlined_call_operand.vmem [shape: f32[2,2,2,128], index: 5, kind: output, shape index: {1}]  }
   0x1   :  { %s1188_s20 = smov 0   ;;  %s1190_s21 = smov 0  }
   0x2   :  { %s1192_s22 = smov 0  }
   0x3 LB: > { %s25_s23 = sadd.s32 1, %s1142_s20  ;;  %s28_s24 = sadd.s32 1, %s1146_s21  ;;  %s1150_s22 = sphi %s1192_s22, %s16_s22   ;;  %s1146_s21 = sphi %s1190_s21, %s1512_s21   ;;  %s1142_s20 = sphi %s1188_s20, %s1511_s20   ;;  %s1138_s19 = sphi %s1186_s19, %s1510_s19   ;;  %s1134_s18 = sphi %s1184_s18, %s1509_s18  }
   0x4   : > { %p26_p0 = scmp.ge.s32.totalorder %s25_s23, 2  ;;  %p858_p1 = scmp.ge.s32.totalorder %s1150_s22, 1 }
   0x5   : > { %p265_p2 = scmp.lt.s32.totalorder %s1150_s22, 5 }
   0x6   : > { %s1514_s23 = smov (%p26_p0, %s25_s23), 0  ;;  %s1516_s24 = smov (!%p26_p0, %s28_s24), %s1146_s21 }
   0x7   : > { %p266_p3 = pnand %p858_p1, %p265_p2  ;;  %p30_p4 = scmp.ge.s32.totalorder %s1516_s24, 2 }
   0x8   : > { %p329_p5 = scmp.lt.s32.totalorder (!%p266_p3), %s1138_s19, 1  ;;  %p331_p6 = scmp.lt.s32.totalorder (!%p266_p3), %s1134_s18, 1 }
   0x9   : > { %s1518_s24 = smov (%p30_p4, %s1516_s24), 0  ;;  %269 = sbr.rel (%p266_p3) target bundleno = 291 (0x123), region = 36 }
   0xa   : > { %s1254_s16 = sadd.s32 (!%p266_p3), 4294967295, %s1134_s18  ;;  %p382_p9 = scmp.gt.s32.totalorder (!%p266_p3), %s1134_s18, 0 }
   0xb   : > { %p338_p7 = scmp.gt.s32.totalorder (!%p266_p3), %s1254_s16, 0  ;;  %p862_p8 = scmp.lt.s32.totalorder (!%p266_p3), %s1254_s16, 1 }
   0xc   : > { %s351_s7 = sadd.s32 (!%p266_p3), 1, %s1134_s18 }
   0xd   : > { %p1390_p10 = scmp.lt.s32.totalorder (!%p266_p3), %s351_s7, 1 }
   0xe   : > { %v893_v0 = vld [vmem:[%s1503_s3 + $0xf8] sm:$0xff]  ;;  %v1152_v2 = vmov 0.0   ;;  %v892_v3 = vld [vmem:[%s1503_s3 + $0xf0] sm:$0xff]  ;;  %v891_v5 = vld [vmem:[%s1503_s3 + $0xe8] sm:$0xff]  ;;  %s1520_s19 = smov (!%p329_p5, %s1138_s19), 1  ;;  %vm397_vm1 = vcmask 1040384  }
   0xf   : > { %v421_v1 = vld [vmem:[%s1503_s3 + $0x78] sm:$0xff]  ;;  %965 = vmatprep.subr.mxu0 %v1152_v2  ;;  %1000 = vmatprep.subr.mxu1 %v1152_v2  ;;  %v420_v4 = vld [vmem:[%s1503_s3 + $0x70] sm:$0xff]  ;;  %v419_v6 = vld [vmem:[%s1503_s3 + $0x68] sm:$0xff]  ;;  %s332_s28 = scalar_select %p331_p6, %s1134_s18, 1  ;;  %vm1153_vm2 = vmmov 0   ;;  %vm404_vm4 = vcmask 1046528  }
  0x10   : > { %966 = vmatpush3.msra.mxu0 %v893_v0  ;;  %1001 = vmatpush3.msra.mxu1 %v421_v1  ;;  %v890_v7 = vld [vmem:[%s1503_s3 + $0xe0] sm:$0xff]  ;;  %v889_v9 = vld [vmem:[%s1503_s3 + $0xd8] sm:$0xff]  ;;  %v888_v11 = vld [vmem:[%s1503_s3 + $0xd0] sm:$0xff]  ;;  %s1276_s8 = sshll.u32 %s1520_s19, 1  ;;  %s1524_s7 = smov (!%p1390_p10, %s351_s7), 1 }
  0x11   : > { %967 = vmatprep.subr.mxu0 %v1152_v2  ;;  %1002 = vmatprep.subr.mxu1 %v1152_v2  ;;  %v418_v8 = vld [vmem:[%s1503_s3 + $0x60] sm:$0xff]  ;;  %v417_v10 = vld [vmem:[%s1503_s3 + $0x58] sm:$0xff]  ;;  %v416_v12 = vld [vmem:[%s1503_s3 + $0x50] sm:$0xff]  ;;  %s339_s13 = scalar_select %p338_p7, %s1254_s16, 0 }
  0x12   : > { %968 = vmatpush3.msra.mxu0 %v892_v3  ;;  %1003 = vmatpush3.msra.mxu1 %v420_v4  ;;  %v887_v13 = vld [vmem:[%s1503_s3 + $0xc8] sm:$0xff]  ;;  %v886_v15 = vld [vmem:[%s1503_s3 + $0xc0] sm:$0xff]  ;;  %s1297_s25 = sadd.s32 %s1276_s8, %s332_s28  ;;  %v885_v17 = vld [vmem:[%s1503_s3 + $0xb8] sm:$0xff]  ;;  %s1526_s7 = smov (!%p1390_p10, %s1524_s7), 1 }
  0x13   : > { %969 = vmatprep.subr.mxu0 %v1152_v2  ;;  %1004 = vmatprep.subr.mxu1 %v1152_v2  ;;  %v415_v14 = vld [vmem:[%s1503_s3 + $0x48] sm:$0xff]  ;;  %v414_v16 = vld [vmem:[%s1503_s3 + $0x40] sm:$0xff]  ;;  %v413_v18 = vld [vmem:[%s1503_s3 + $0x38] sm:$0xff]  ;;  %s1522_s13 = smov (!%p862_p8, %s339_s13), 1  ;;  %s860_s10 = sshll.u32 %s1297_s25, 3 }
  0x14   : > { %970 = vmatpush3.msra.mxu0 %v891_v5  ;;  %1005 = vmatpush3.msra.mxu1 %v419_v6  ;;  %v884_v19 = vld [vmem:[%s1503_s3 + $0xb0] sm:$0xff]  ;;  %s345_s9 = sadd.s32 %s1522_s13, %s1276_s8  ;;  %v883_v21 = vld [vmem:[%s1503_s3 + $0xa8] sm:$0xff]  ;;  %v882_v23 = vld [vmem:[%s1503_s3 + $0xa0] sm:$0xff]  ;;  %s336_s30 = scalar_lea.vmem %s1500_s0, %s860_s10 }
  0x15   : > { %971 = vmatprep.subr.mxu0 %v1152_v2  ;;  %1006 = vmatprep.subr.mxu1 %v1152_v2  ;;  %v412_v20 = vld [vmem:[%s1503_s3 + $0x30] sm:$0xff]  ;;  %v411_v22 = vld [vmem:[%s1503_s3 + $0x28] sm:$0xff]  ;;  %s384_s15 = scalar_select %p382_p9, 1, 0  ;;  %v410_v24 = vld [vmem:[%s1503_s3 + $0x20] sm:$0xff] }
  0x16   : > { %972 = vmatpush3.msra.mxu0 %v890_v7  ;;  %1007 = vmatpush3.msra.mxu1 %v418_v8  ;;  %s868_s13 = sshll.u32 %s345_s9, 3  ;;  %v881_v25 = vld [vmem:[%s1503_s3 + $0x98] sm:$0xff]  ;;  %v880_v28 = vld [vmem:[%s1503_s3 + $0x90] sm:$0xff]  ;;  %v1360_v30 = vld [vmem:[%s336_s30] sm:$0xff]  ;;  %s359_s9 = sadd.s32 %s1276_s8, %s1526_s7 }
  0x17   : > { %973 = vmatprep.subr.mxu0 %v1152_v2  ;;  %1008 = vmatprep.subr.mxu1 %v1152_v2  ;;  %v409_v26 = vld [vmem:[%s1503_s3 + $0x18] sm:$0xff]  ;;  %s347_s14 = scalar_lea.vmem %s1501_s1, %s868_s13  ;;  %v385_v27 = vstv %s384_s15  ;;  %v408_v29 = vld [vmem:[%s1503_s3 + $0x10] sm:$0xff]  ;;  %v879_v33 = vld [vmem:[%s1503_s3 + $0x88] sm:$0xff]  ;;  %v395_v35 = vrot.slane %v1360_v30, 7  ;;  %s873_s16 = sshll.u32 %s359_s9, 3  ;;  %v399_v57 = vrot.slane %v1360_v30, 1 }
  0x18   : > { %974 = vmatpush3.msra.mxu0 %v889_v9  ;;  %1009 = vmatpush3.msra.mxu1 %v417_v10  ;;  %v383_v31 = vld [vmem:[%s347_s14 + $0x7] sm:$0x1]  ;;  %vm1362_vm0 = vcmp.eq.s32.totalorder %v385_v27, 1  ;;  %v407_v34 = vld [vmem:[%s1503_s3 + $0x8] sm:$0xff]  ;;  %v909_v40 = vld [vmem:[%s1503_s3 + $0x178] sm:$0xff]  ;;  %s361_s15 = scalar_lea.vmem %s1502_s2, %s873_s16  ;;  %s372_s27 = scalar_lea.vmem %s1504_s4, %s860_s10 }
  0x19   : > { %975 = vmatprep.subr.mxu0 %v1152_v2  ;;  %1010 = vmatprep.subr.mxu1 %v1152_v2  ;;  %v878_v36 = vld [vmem:[%s1503_s3 + $0x80] sm:$0xff]  ;;  %v387_v37 = vsel %vm1362_vm0, %v383_v31, 0.0  ;;  %v908_v41 = vld [vmem:[%s1503_s3 + $0x170] sm:$0xff]  ;;  %v907_v42 = vld [vmem:[%s1503_s3 + $0x168] sm:$0xff]  ;;  %s390_s17 = scalar_select %p331_p6, 1, 0 }
  0x1a   : > { %976 = vmatpush3.msra.mxu0 %v888_v11  ;;  %1011 = vmatpush3.msra.mxu1 %v416_v12  ;;  %v406_v38 = vld [vmem:[%s1503_s3] sm:$0xff]  ;;  %v398_v39 = vsel %vm397_vm1, %v387_v37, %v395_v35  ;;  %v905_v44 = vld [vmem:[%s1503_s3 + $0x158] sm:$0xff]  ;;  %v904_v45 = vld [vmem:[%s1503_s3 + $0x150] sm:$0xff] }
  0x1b   : > { %977 = vmatprep.subr.mxu0 %v1152_v2  ;;  %1012 = vmatprep.subr.mxu1 %v1152_v2  ;;  %v906_v43 = vld [vmem:[%s1503_s3 + $0x160] sm:$0xff]  ;;  %v903_v46 = vld [vmem:[%s1503_s3 + $0x148] sm:$0xff]  ;;  %v901_v48 = vld [vmem:[%s1503_s3 + $0x138] sm:$0xff]  ;;  %v391_v50 = vstv %s390_s17 }
  0x1c   : > { %978 = vmatpush3.msra.mxu0 %v887_v13  ;;  %1013 = vmatpush3.msra.mxu1 %v415_v14  ;;  %v902_v47 = vld [vmem:[%s1503_s3 + $0x140] sm:$0xff]  ;;  %v900_v49 = vld [vmem:[%s1503_s3 + $0x130] sm:$0xff]  ;;  %v899_v51 = vld [vmem:[%s1503_s3 + $0x128] sm:$0xff]  ;;  %vm392_vm3 = vcmp.eq.s32.totalorder %v391_v50, 1 }
  0x1d   : > { %979 = vmatprep.subr.mxu0 %v1152_v2  ;;  %1014 = vmatprep.subr.mxu1 %v1152_v2  ;;  %v389_v52 = vld [vmem:[%s361_s15] sm:$0x1]  ;;  %v897_v54 = vld [vmem:[%s1503_s3 + $0x118] sm:$0xff]  ;;  %v896_v56 = vld [vmem:[%s1503_s3 + $0x110] sm:$0xff]  ;;  %s877_s15 = sshll.u32 %s1297_s25, 1 }
  0x1e   : > { %980 = vmatpush3.msra.mxu0 %v886_v15  ;;  %1015 = vmatpush3.msra.mxu1 %v414_v16  ;;  %v898_v53 = vld [vmem:[%s1503_s3 + $0x120] sm:$0xff]  ;;  %v393_v55 = vsel %vm392_vm3, %v389_v52, 0.0  ;;  %v895_v59 = vld [vmem:[%s1503_s3 + $0x108] sm:$0xff]  ;;  %s380_s10 = scalar_lea.vmem %s1505_s5, %s877_s15 }
  0x1f   : > { %981 = vmatprep.subr.mxu0 %v1152_v2  ;;  %1016 = vmatprep.subr.mxu1 %v1152_v2  ;;  %v402_v58 = vrot.slane %v393_v55, 1  ;;  %v894_v60 = vld [vmem:[%s1503_s3 + $0x100] sm:$0xff] }
  0x20   : > { %982 = vmatpush3.msra.mxu0 %v885_v17  ;;  %1017 = vmatpush3.msra.mxu1 %v413_v18 }
  0x21   : > { %983 = vmatprep.subr.mxu0 %v1152_v2  ;;  %1018 = vmatprep.subr.mxu1 %v1152_v2  ;;  %v405_v61 = vsel %vm404_vm4, %v399_v57, %v402_v58 }
  0x22   : > { %984 = vmatpush3.msra.mxu0 %v884_v19  ;;  %1019 = vmatpush3.msra.mxu1 %v412_v20 }
  0x23   : > { %985 = vmatprep.subr.mxu0 %v1152_v2  ;;  %1020 = vmatprep.subr.mxu1 %v1152_v2 }
  0x24   : > { %986 = vmatpush3.msra.mxu0 %v883_v21  ;;  %1021 = vmatpush3.msra.mxu1 %v411_v22 }
  0x25   : > { %987 = vmatprep.subr.mxu0 %v1152_v2  ;;  %1022 = vmatprep.subr.mxu1 %v1152_v2 }
  0x26   : > { %988 = vmatpush3.msra.mxu0 %v882_v23  ;;  %1023 = vmatpush3.msra.mxu1 %v410_v24 }
  0x27   : > { %989 = vmatprep.subr.mxu0 %v1152_v2  ;;  %1024 = vmatprep.subr.mxu1 %v1152_v2 }
  0x28   : > { %990 = vmatpush3.msra.mxu0 %v881_v25  ;;  %1025 = vmatpush3.msra.mxu1 %v409_v26 }
  0x29   : > { %991 = vmatprep.subr.mxu0 %v1152_v2  ;;  %1026 = vmatprep.subr.mxu1 %v1152_v2 }
  0x2a   : > { %992 = vmatpush3.msra.mxu0 %v880_v28  ;;  %1027 = vmatpush3.msra.mxu1 %v408_v29 }
  0x2b   : > { %993 = vmatprep.subr.mxu0 %v1152_v2  ;;  %1028 = vmatprep.subr.mxu1 %v1152_v2 }
  0x2c   : > { %994 = vmatpush3.msra.mxu0 %v879_v33  ;;  %1029 = vmatpush3.msra.mxu1 %v407_v34 }
  0x2d   : > { %995 = vmatprep.subr.mxu0 %v1152_v2  ;;  %997 = vmatprep.mubr.msk.f32.mxu0 %vm1153_vm2, %v1152_v2 }
  0x2e   : > { %996 = vmatpush3.msra.mxu0 %v878_v36  ;;  %1030 = vmatprep.subr.mxu1 %v1152_v2 }
  0x2f   : > { %998 = vmatmul.mubr.f32.vlgmr.msra.gmra.mxu0 %v1360_v30  ;;  %1031 = vmatpush3.msra.mxu1 %v406_v38 }
  0x30   : > { %1032 = vmatprep.mubr.msk.f32.mxu1 %vm1153_vm2, %v1152_v2  ;;  %1035 = vmatprep.subr.mxu0 %v1152_v2 }
  0x31   : > { %1033 = vmatmul.mubr.f32.vlgmr.msra.gmra.mxu1 %v398_v39  ;;  %1036 = vmatpush3.msra.mxu0 %v909_v40 }
  0x32   : > { %1037 = vmatprep.subr.mxu0 %v1152_v2  ;;  %1067 = vmatprep.mubr.msk.f32.mxu0 %vm1153_vm2, %v1152_v2 }
  0x33   : > { %1038 = vmatpush3.msra.mxu0 %v908_v41 }
  0x34   : > { %1039 = vmatprep.subr.mxu0 %v1152_v2 }
  0x35   : > { %1040 = vmatpush3.msra.mxu0 %v907_v42 }
  0x36   : > { %1041 = vmatprep.subr.mxu0 %v1152_v2 }
  0x37   : > { %1042 = vmatpush3.msra.mxu0 %v906_v43 }
  0x38   : > { %1043 = vmatprep.subr.mxu0 %v1152_v2 }
  0x39   : > { %1044 = vmatpush3.msra.mxu0 %v905_v44 }
  0x3a   : > { %1045 = vmatprep.subr.mxu0 %v1152_v2 }
  0x3b   : > { %1046 = vmatpush3.msra.mxu0 %v904_v45 }
  0x3c   : > { %1047 = vmatprep.subr.mxu0 %v1152_v2 }
  0x3d   : > { %1048 = vmatpush3.msra.mxu0 %v903_v46 }
  0x3e   : > { %1049 = vmatprep.subr.mxu0 %v1152_v2 }
  0x3f   : > { %1050 = vmatpush3.msra.mxu0 %v902_v47 }
  0x40   : > { %1051 = vmatprep.subr.mxu0 %v1152_v2 }
  0x41   : > { %1052 = vmatpush3.msra.mxu0 %v901_v48 }
  0x42   : > { %1053 = vmatprep.subr.mxu0 %v1152_v2 }
  0x43   : > { %1054 = vmatpush3.msra.mxu0 %v900_v49 }
  0x44   : > { %1055 = vmatprep.subr.mxu0 %v1152_v2 }
  0x45   : > { %1056 = vmatpush3.msra.mxu0 %v899_v51 }
  0x46   : > { %1057 = vmatprep.subr.mxu0 %v1152_v2 }
  0x47   : > { %1058 = vmatpush3.msra.mxu0 %v898_v53 }
  0x48   : > { %1059 = vmatprep.subr.mxu0 %v1152_v2 }
  0x49   : > { %1060 = vmatpush3.msra.mxu0 %v897_v54 }
  0x4a   : > { %1061 = vmatprep.subr.mxu0 %v1152_v2 }
  0x4b   : > { %1062 = vmatpush3.msra.mxu0 %v896_v56 }
  0x4c   : > { %1063 = vmatprep.subr.mxu0 %v1152_v2 }
  0x4d   : > { %1064 = vmatpush3.msra.mxu0 %v895_v59 }
  0x4e   : > { %1065 = vmatprep.subr.mxu0 %v1152_v2 }
  0x4f   : > { %1066 = vmatpush3.msra.mxu0 %v894_v60 }
  0x50   : > { %1068 = vmatmul.mubr.f32.vlgmr.msra.gmra.mxu0 %v405_v61 }
  0xef   : > { %v505_v62 = vpop.f32.mrf.mxu0 }
  0xf1   : > { %v575_v63 = vpop.f32.mrf.mxu1  ;;  %v999_v0 = vpop.f32.mrf.mxu0 }
  0xf2   : > { %v576_v3 = vadd.f32 %v575_v63, %v505_v62 }
  0xf3   : > { %v1034_v1 = vpop.f32.mrf.mxu1 }
 0x110   : > { %v662_v4 = vpop.f32.mrf.mxu0 }
 0x111   : > { %v666_v5 = vadd.f32 %v662_v4, %v576_v3 }
 0x112   : > { %v1069_v6 = vpop.f32.mrf.mxu0 }
 0x113   : > { %667 = vst [vmem:[%s372_s27] sm:$0xff] %v666_v5  ;;  %v668_v7 = vrot.slane %v666_v5, 4  ;;  %v674_v8 = vmul.f32 %v666_v5, %v666_v5 }
 0x115   : > { %v669_v2 = vadd.f32 %v668_v7, %v666_v5  ;;  %v675_v9 = vrot.slane %v674_v8, 4 }
 0x117   : > { %v670_v10 = vrot.slane %v669_v2, 2  ;;  %v676_v11 = vadd.f32 %v675_v9, %v674_v8 }
 0x119   : > { %v671_v12 = vadd.f32 %v670_v10, %v669_v2  ;;  %v677_v13 = vrot.slane %v676_v11, 2 }
 0x11b   : > { %v672_v14 = vrot.slane %v671_v12, 1  ;;  %v678_v15 = vadd.f32 %v677_v13, %v676_v11 }
 0x11d   : > { %v679_v16 = vrot.slane %v678_v15, 1  ;;  %v673_v17 = vadd.f32 %v672_v14, %v671_v12 }
 0x11f   : > { %v680_v18 = vadd.f32 %v679_v16, %v678_v15 }
 0x121   : > { %v681_v19 = vsel %vm397_vm1, %v673_v17, %v680_v18 }
 0x122   : > { %682 = vst [vmem:[%s380_s10] sm:$0x3] %v681_v19 }
 0x123 PF: > { %s16_s22 = sadd.s32 1, %s1150_s22   ;;  %s1509_s18 = smov %s1142_s20 }
 0x124   : > { %p13_p11 = scmp.ge.s32.totalorder %s16_s22, 6   ;;  %s1510_s19 = smov %s1146_s21 }
 0x125   : > { %s1511_s20 = smov %s1514_s23  ;;  %s1512_s21 = smov %s1518_s24 }
 0x126   :  { %15 = sbr.rel (!%p13_p11) target bundleno = 3 (0x3), region = 86 }

// kernel: tile.23
= control target key start
LH: loop header
LB: loop body
LE: loop exit
PB: predicated region body
PF: predicated region fallthrough
CT: control target
= control target key end

     0   :  { %s28_s0 = inlined_call_operand.vmem [shape: f32[8], index: 0, kind: input, shape index: {}]   ;;  %s29_s1 = inlined_call_operand.vmem [shape: f32[16,8], index: 1, kind: output, shape index: {}]  }
   0x1   :  { %v4_v0 = vld [vmem:[%s28_s0] ss:$0 sm:$0xff] }
   0x2   :  { %5 = vst [vmem:[%s29_s1] sm:$0xff] %v4_v0  ;;  %8 = vst [vmem:[%s29_s1 + $0x8] sm:$0xff] %v4_v0 }

// kernel: tile.24
= control target key start
LH: loop header
LB: loop body
LE: loop exit
PB: predicated region body
PF: predicated region fallthrough
CT: control target
= control target key end

     0   :  { %s133_s10 = smov 120   ;;  %s134_s11 = smov 104   ;;  %vm3_vm0 = vcmask 64512   ;;  %vm9_vm1 = vcmask 1048512   ;;  %vm15_vm2 = vcmask 982912   ;;  %vm21_vm3 = vcmask 917312   ;;  %s209_s0 = inlined_call_operand.vmem [shape: f32[16,8], index: 0, kind: input, shape index: {}]   ;;  %s210_s1 = inlined_call_operand.vmem [shape: f32[1,128], index: 1, kind: output, shape index: {}]  }
   0x1   :  { %v103_v0 = vld [vmem:[%s209_s0 + $0xf] sm:$0x1]   ;;  %v105_v1 = vld [vmem:[%s209_s0 + $0xd] sm:$0x1]   ;;  %v104_v2 = vld [vmem:[%s209_s0 + $0xe] sm:$0x1]  }
   0x2   :  { %7 = vrot.lane.b32.xlu0 %v103_v0, %s133_s10  ;;  %19 = vrot.lane.b32.xlu1 %v105_v1, %s134_s11  ;;  %v106_v3 = vld [vmem:[%s209_s0 + $0xc] sm:$0x1]   ;;  %s135_s16 = smov 112   ;;  %s136_s17 = smov 96   ;;  %v107_v4 = vld [vmem:[%s209_s0 + $0xb] sm:$0x1]  }
   0x3   :  { %v108_v5 = vld [vmem:[%s209_s0 + $0xa] sm:$0x1]   ;;  %v2_v6 = vld [vmem:[%s209_s0] sm:$0x1]   ;;  %s137_s24 = smov 88   ;;  %s138_s25 = smov 80  }
   0x4   :  { %4 = vst.msk [vmem:[#allocation0] sm:$0x1] %vm3_vm0, %v2_v6   ;;  %v109_v7 = vld [vmem:[%s209_s0 + $0x9] sm:$0x1]   ;;  %v110_v8 = vld [vmem:[%s209_s0 + $0x8] sm:$0x1]  }
   0x5   :  { %s139_s30 = smov 72   ;;  %s140_s2 = smov 64   ;;  %v111_v9 = vld [vmem:[%s209_s0 + $0x7] sm:$0x1]   ;;  %v112_v10 = vld [vmem:[%s209_s0 + $0x6] sm:$0x1]  }
   0x6   :  { %13 = vrot.lane.b32.xlu0 %v104_v2, %s135_s16  ;;  %25 = vrot.lane.b32.xlu1 %v106_v3, %s136_s17  ;;  %s141_s7 = smov 56   ;;  %s142_s8 = smov 48   ;;  %v113_v11 = vld [vmem:[%s209_s0 + $0x5] sm:$0x1]   ;;  %v114_v12 = vld [vmem:[%s209_s0 + $0x4] sm:$0x1]  }
   0x7   :  { %s143_s13 = smov 40   ;;  %s144_s14 = smov 32   ;;  %v115_v13 = vld [vmem:[%s209_s0 + $0x3] sm:$0x1]   ;;  %v116_v14 = vld [vmem:[%s209_s0 + $0x2] sm:$0x1]  }
   0x8   :  { %s145_s19 = smov 24   ;;  %s146_s20 = smov 16   ;;  %v117_v15 = vld [vmem:[%s209_s0 + $0x1] sm:$0x1]   ;;  %vm27_vm4 = vcmask 851712   ;;  %vm33_vm5 = vcmask 786112  }
   0x9   :  { %s147_s0 = smov 8   ;;  %vm39_vm6 = vcmask 720512   ;;  %vm45_vm7 = vcmask 654912   ;;  %vm51_vm8 = vcmask 589312   ;;  %vm57_vm9 = vcmask 523712  }
   0xa   :  { %31 = vrot.lane.b32.xlu0 %v107_v4, %s137_s24  ;;  %37 = vrot.lane.b32.xlu1 %v108_v5, %s138_s25  ;;  %vm63_vm10 = vcmask 458112   ;;  %vm69_vm11 = vcmask 392512   ;;  %vm75_vm12 = vcmask 326912   ;;  %vm81_vm13 = vcmask 261312  }
   0xb   :  { %vm87_vm14 = vcmask 195712   ;;  %vm93_vm15 = vcmask 130112  }
   0xe   :  { %43 = vrot.lane.b32.xlu0 %v109_v7, %s139_s30  ;;  %49 = vrot.lane.b32.xlu1 %v110_v8, %s140_s2 }
  0x12   :  { %55 = vrot.lane.b32.xlu0 %v111_v9, %s141_s7  ;;  %61 = vrot.lane.b32.xlu1 %v112_v10, %s142_s8 }
  0x16   :  { %67 = vrot.lane.b32.xlu0 %v113_v11, %s143_s13  ;;  %73 = vrot.lane.b32.xlu1 %v114_v12, %s144_s14 }
  0x1a   :  { %79 = vrot.lane.b32.xlu0 %v115_v13, %s145_s19  ;;  %85 = vrot.lane.b32.xlu1 %v116_v14, %s146_s20 }
  0x1e   :  { %91 = vrot.lane.b32.xlu0 %v117_v15, %s147_s0 }
  0x74   :  { %v8_v16 = vpop.permute.xlu0 %7   ;;  %v20_v17 = vpop.permute.xlu1 %19  }
  0x75   :  { %10 = vst.msk [vmem:[#allocation0] sm:$0x1] %vm9_vm1, %v8_v16  }
  0x78   :  { %v14_v18 = vpop.permute.xlu0 %13   ;;  %v26_v19 = vpop.permute.xlu1 %25  }
  0x79   :  { %16 = vst.msk [vmem:[#allocation0] sm:$0x1] %vm15_vm2, %v14_v18  }
  0x7a   :  { %22 = vst.msk [vmem:[#allocation0] sm:$0x1] %vm21_vm3, %v20_v17  }
  0x7b   :  { %28 = vst.msk [vmem:[#allocation0] sm:$0x1] %vm27_vm4, %v26_v19  }
  0x7c   :  { %v32_v20 = vpop.permute.xlu0 %31   ;;  %v38_v21 = vpop.permute.xlu1 %37  }
  0x7d   :  { %34 = vst.msk [vmem:[#allocation0] sm:$0x1] %vm33_vm5, %v32_v20  }
  0x7e   :  { %40 = vst.msk [vmem:[#allocation0] sm:$0x1] %vm39_vm6, %v38_v21  }
  0x80   :  { %v44_v22 = vpop.permute.xlu0 %43   ;;  %v50_v23 = vpop.permute.xlu1 %49  }
  0x81   :  { %46 = vst.msk [vmem:[#allocation0] sm:$0x1] %vm45_vm7, %v44_v22  }
  0x82   :  { %52 = vst.msk [vmem:[#allocation0] sm:$0x1] %vm51_vm8, %v50_v23  }
  0x84   :  { %v56_v24 = vpop.permute.xlu0 %55   ;;  %v62_v25 = vpop.permute.xlu1 %61  }
  0x85   :  { %58 = vst.msk [vmem:[#allocation0] sm:$0x1] %vm57_vm9, %v56_v24  }
  0x86   :  { %64 = vst.msk [vmem:[#allocation0] sm:$0x1] %vm63_vm10, %v62_v25  }
  0x88   :  { %v68_v26 = vpop.permute.xlu0 %67   ;;  %v74_v27 = vpop.permute.xlu1 %73  }
  0x89   :  { %70 = vst.msk [vmem:[#allocation0] sm:$0x1] %vm69_vm11, %v68_v26  }
  0x8a   :  { %76 = vst.msk [vmem:[#allocation0] sm:$0x1] %vm75_vm12, %v74_v27  }
  0x8c   :  { %v80_v28 = vpop.permute.xlu0 %79   ;;  %v86_v29 = vpop.permute.xlu1 %85  }
  0x8d   :  { %82 = vst.msk [vmem:[#allocation0] sm:$0x1] %vm81_vm13, %v80_v28  }
  0x8e   :  { %88 = vst.msk [vmem:[#allocation0] sm:$0x1] %vm87_vm14, %v86_v29  }
  0x90   :  { %v92_v30 = vpop.permute.xlu0 %91  }
  0x91   :  { %94 = vst.msk [vmem:[#allocation0] sm:$0x1] %vm93_vm15, %v92_v30  }
  0x98   :  { %v99_v31 = vld [vmem:[#allocation0] sm:$0x1] }
  0x99   :  { %102 = vst [vmem:[%s210_s1] sm:$0x1] %v99_v31 }

// kernel: basic_block_forward.4
= control target key start
LH: loop header
LB: loop body
LE: loop exit
PB: predicated region body
PF: predicated region fallthrough
CT: control target
= control target key end

     0   :  { %s1271_s24 = smov 0   ;;  %s1273_s25 = smov 0   ;;  %s1596_s0 = inlined_call_operand.vmem [shape: f32[2,16,128], index: 0, kind: input, shape index: {}, may-alias: {0,1,2}]   ;;  %s1597_s1 = inlined_call_operand.vmem [shape: f32[2,16,128], index: 1, kind: input, shape index: {}, may-alias: {0,1,2}]   ;;  %s1598_s2 = inlined_call_operand.vmem [shape: f32[2,16,128], index: 2, kind: input, shape index: {}, may-alias: {0,1,2}]   ;;  %s1599_s3 = inlined_call_operand.vmem [shape: f32[1,128], index: 3, kind: input, shape index: {}]   ;;  %s1600_s4 = inlined_call_operand.vmem [shape: f32[1,128], index: 4, kind: input, shape index: {}]   ;;  %s1601_s5 = inlined_call_operand.vmem [shape: f32[3,128,128], index: 5, kind: input, shape index: {}]   ;;  %s1602_s6 = inlined_call_operand.vmem [shape: f32[2,16,128], index: 6, kind: output, shape index: {0}]   ;;  %s1603_s7 = inlined_call_operand.vmem [shape: f32[2,2,2,128], index: 7, kind: output, shape index: {1}]  }
   0x1   :  { %s1275_s26 = smov 0   ;;  %s1277_s27 = smov 0  }
   0x2   :  { %s1279_s28 = smov 0  }
   0x3 LB: > { %s27_s29 = sadd.s32 1, %s1219_s26  ;;  %s30_s30 = sadd.s32 1, %s1223_s27  ;;  %s1227_s28 = sphi %s1279_s28, %s18_s28   ;;  %s1223_s27 = sphi %s1277_s27, %s1608_s27   ;;  %s1219_s26 = sphi %s1275_s26, %s1607_s26   ;;  %s1215_s25 = sphi %s1273_s25, %s1606_s25   ;;  %s1211_s24 = sphi %s1271_s24, %s1605_s24  }
   0x4   : > { %p28_p0 = scmp.ge.s32.totalorder %s27_s29, 2  ;;  %p935_p1 = scmp.ge.s32.totalorder %s1227_s28, 1 }
   0x5   : > { %p315_p2 = scmp.lt.s32.totalorder %s1227_s28, 5 }
   0x6   : > { %s1610_s29 = smov (%p28_p0, %s27_s29), 0  ;;  %s1612_s30 = smov (!%p28_p0, %s30_s30), %s1223_s27 }
   0x7   : > { %p316_p3 = pnand %p935_p1, %p315_p2  ;;  %p32_p4 = scmp.ge.s32.totalorder %s1612_s30, 2 }
   0x8   : > { %p383_p5 = scmp.lt.s32.totalorder (!%p316_p3), %s1215_s25, 1  ;;  %p385_p6 = scmp.lt.s32.totalorder (!%p316_p3), %s1211_s24, 1 }
   0x9   : > { %s1614_s30 = smov (%p32_p4, %s1612_s30), 0  ;;  %319 = sbr.rel (%p316_p3) target bundleno = 291 (0x123), region = 44 }
   0xa   : > { %p453_p9 = scmp.gt.s32.totalorder (!%p316_p3), %s1211_s24, 0 }
   0xe   : > { %v970_v0 = vld [vmem:[%s1601_s5 + $0xf8] sm:$0xff]  ;;  %v438_v2 = vlaneseq  ;;  %v1229_v3 = vmov 0.0   ;;  %v969_v4 = vld [vmem:[%s1601_s5 + $0xf0] sm:$0xff]  ;;  %s1616_s25 = smov (!%p383_p5, %s1215_s25), 1  ;;  %v968_v6 = vld [vmem:[%s1601_s5 + $0xe8] sm:$0xff]  ;;  %vm474_vm1 = vcmask 1040384  }
   0xf   : > { %v498_v1 = vld [vmem:[%s1601_s5 + $0x78] sm:$0xff]  ;;  %1042 = vmatprep.subr.mxu0 %v1229_v3  ;;  %1077 = vmatprep.subr.mxu1 %v1229_v3  ;;  %v497_v5 = vld [vmem:[%s1601_s5 + $0x70] sm:$0xff]  ;;  %v496_v7 = vld [vmem:[%s1601_s5 + $0x68] sm:$0xff]  ;;  %s386_s20 = scalar_select %p385_p6, %s1211_s24, 1  ;;  %vm1230_vm2 = vmmov 0   ;;  %vm481_vm4 = vcmask 1046528  }
  0x10   : > { %1043 = vmatpush3.msra.mxu0 %v970_v0  ;;  %1078 = vmatpush3.msra.mxu1 %v498_v1  ;;  %s1329_s21 = sshll.u32 %s1616_s25, 1  ;;  %v439_v8 = vshrl.u32 %v438_v2, 7  ;;  %v967_v9 = vld [vmem:[%s1601_s5 + $0xe0] sm:$0xff]  ;;  %s1343_s25 = sadd.s32 4294967295, %s1211_s24  ;;  %v966_v11 = vld [vmem:[%s1601_s5 + $0xd8] sm:$0xff]  ;;  %v965_v14 = vld [vmem:[%s1601_s5 + $0xd0] sm:$0xff] }
  0x11   : > { %1044 = vmatprep.subr.mxu0 %v1229_v3  ;;  %1079 = vmatprep.subr.mxu1 %v1229_v3  ;;  %v495_v10 = vld [vmem:[%s1601_s5 + $0x60] sm:$0xff]  ;;  %s1340_s10 = sadd.s32 %s1329_s21, %s386_s20  ;;  %v494_v12 = vld [vmem:[%s1601_s5 + $0x58] sm:$0xff]  ;;  %v493_v15 = vld [vmem:[%s1601_s5 + $0x50] sm:$0xff]  ;;  %p392_p7 = scmp.gt.s32.totalorder %s1343_s25, 0 }
  0x12   : > { %1045 = vmatpush3.msra.mxu0 %v969_v4  ;;  %1080 = vmatpush3.msra.mxu1 %v497_v5  ;;  %s937_s15 = sshll.u32 %s1340_s10, 3  ;;  %v440_v13 = vsub.s32 0, %v439_v8  ;;  %p939_p8 = scmp.lt.s32.totalorder %s1343_s25, 1  ;;  %v1372_v16 = vld [vmem:[%s1599_s3] sm:$0x1]  ;;  %v964_v17 = vld [vmem:[%s1601_s5 + $0xc8] sm:$0xff] }
  0x13   : > { %1046 = vmatprep.subr.mxu0 %v1229_v3  ;;  %1081 = vmatprep.subr.mxu1 %v1229_v3  ;;  %s390_s23 = scalar_lea.vmem %s1596_s0, %s937_s15  ;;  %v492_v18 = vld [vmem:[%s1601_s5 + $0x48] sm:$0xff]  ;;  %v963_v19 = vld [vmem:[%s1601_s5 + $0xc0] sm:$0xff]  ;;  %v962_v24 = vld [vmem:[%s1601_s5 + $0xb8] sm:$0xff]  ;;  %s426_s18 = scalar_lea.vmem %s1602_s6, %s937_s15 }
  0x14   : > { %1047 = vmatpush3.msra.mxu0 %v968_v6  ;;  %1082 = vmatpush3.msra.mxu1 %v496_v7  ;;  %s393_s16 = scalar_select %p392_p7, %s1343_s25, 0  ;;  %v441_v20 = vrot.slane %v1372_v16, %v440_v13  ;;  %v491_v21 = vld [vmem:[%s1601_s5 + $0x40] sm:$0xff]  ;;  %v490_v25 = vld [vmem:[%s1601_s5 + $0x38] sm:$0xff]  ;;  %v961_v28 = vld [vmem:[%s1601_s5 + $0xb0] sm:$0xff] }
  0x15   : > { %1048 = vmatprep.subr.mxu0 %v1229_v3  ;;  %1083 = vmatprep.subr.mxu1 %v1229_v3  ;;  %v435_v22 = vld [vmem:[%s390_s23] sm:$0xff]  ;;  %v489_v29 = vld [vmem:[%s1601_s5 + $0x30] sm:$0xff]  ;;  %v960_v31 = vld [vmem:[%s1601_s5 + $0xa8] sm:$0xff]  ;;  %s954_s19 = sshll.u32 %s1340_s10, 1 }
  0x16   : > { %1049 = vmatpush3.msra.mxu0 %v967_v9  ;;  %1084 = vmatpush3.msra.mxu1 %v495_v10  ;;  %v1395_v23 = vld [vmem:[%s1600_s4] sm:$0x1]  ;;  %s1618_s16 = smov (!%p939_p8, %s393_s16), 1  ;;  %v443_v26 = vmul.f32 %v441_v20, %v435_v22  ;;  %v488_v32 = vld [vmem:[%s1601_s5 + $0x28] sm:$0xff]  ;;  %v958_v38 = vld [vmem:[%s1601_s5 + $0x98] sm:$0xff]  ;;  %s434_s15 = scalar_lea.vmem %s1603_s7, %s954_s19 }
  0x17   : > { %1050 = vmatprep.subr.mxu0 %v1229_v3  ;;  %1085 = vmatprep.subr.mxu1 %v1229_v3  ;;  %s399_s13 = sadd.s32 %s1618_s16, %s1329_s21  ;;  %v449_v27 = vrot.slane %v1395_v23, %v440_v13  ;;  %s405_s16 = sadd.s32 1, %s1211_s24  ;;  %v959_v35 = vld [vmem:[%s1601_s5 + $0xa0] sm:$0xff]  ;;  %v486_v39 = vld [vmem:[%s1601_s5 + $0x18] sm:$0xff]  ;;  %v957_v42 = vld [vmem:[%s1601_s5 + $0x90] sm:$0xff] }
  0x18   : > { %1051 = vmatpush3.msra.mxu0 %v966_v11  ;;  %1086 = vmatpush3.msra.mxu1 %v494_v12  ;;  %s945_s25 = sshll.u32 %s399_s13, 3  ;;  %p1433_p10 = scmp.lt.s32.totalorder %s405_s16, 1  ;;  %v487_v36 = vld [vmem:[%s1601_s5 + $0x20] sm:$0xff]  ;;  %v485_v43 = vld [vmem:[%s1601_s5 + $0x10] sm:$0xff]  ;;  %v956_v45 = vld [vmem:[%s1601_s5 + $0x88] sm:$0xff] }
  0x19   : > { %1052 = vmatprep.subr.mxu0 %v1229_v3  ;;  %1087 = vmatprep.subr.mxu1 %v1229_v3  ;;  %s401_s8 = scalar_lea.vmem %s1597_s1, %s945_s25  ;;  %v451_v34 = vadd.f32 %v449_v27, %v443_v26  ;;  %v484_v46 = vld [vmem:[%s1601_s5 + $0x8] sm:$0xff]  ;;  %v955_v48 = vld [vmem:[%s1601_s5 + $0x80] sm:$0xff]  ;;  %v986_v52 = vld [vmem:[%s1601_s5 + $0x178] sm:$0xff] }
  0x1a   : > { %1053 = vmatpush3.msra.mxu0 %v965_v14  ;;  %1088 = vmatpush3.msra.mxu1 %v493_v15  ;;  %v454_v30 = vld [vmem:[%s401_s8 + $0x7] sm:$0x1]  ;;  %s458_s13 = scalar_select %p453_p9, 1, 0  ;;  %v985_v53 = vld [vmem:[%s1601_s5 + $0x170] sm:$0xff]  ;;  %v984_v54 = vld [vmem:[%s1601_s5 + $0x168] sm:$0xff] }
  0x1b   : > { %1054 = vmatprep.subr.mxu0 %v1229_v3  ;;  %1089 = vmatprep.subr.mxu1 %v1229_v3  ;;  %v455_v33 = vmul.f32 %v454_v30, %v1372_v16  ;;  %s1620_s16 = smov (!%p1433_p10, %s405_s16), 1  ;;  %v1458_v41 = vmax.f32 %v451_v34, 0.0  ;;  %v483_v50 = vld [vmem:[%s1601_s5] sm:$0xff]  ;;  %v982_v56 = vld [vmem:[%s1601_s5 + $0x158] sm:$0xff]  ;;  %v981_v58 = vld [vmem:[%s1601_s5 + $0x150] sm:$0xff] }
  0x1c   : > { %1055 = vmatpush3.msra.mxu0 %v964_v17  ;;  %1090 = vmatpush3.msra.mxu1 %v492_v18  ;;  %v459_v40 = vstv %s458_s13  ;;  %s1622_s16 = smov (!%p1433_p10, %s1620_s16), 1  ;;  %v983_v55 = vld [vmem:[%s1601_s5 + $0x160] sm:$0xff]  ;;  %v980_v59 = vld [vmem:[%s1601_s5 + $0x148] sm:$0xff]  ;;  %v978_v62 = vld [vmem:[%s1601_s5 + $0x138] sm:$0xff] }
  0x1d   : > { %1056 = vmatprep.subr.mxu0 %v1229_v3  ;;  %1091 = vmatprep.subr.mxu1 %v1229_v3  ;;  %v456_v37 = vadd.f32 %v455_v33, %v1395_v23  ;;  %vm460_vm0 = vcmp.eq.s32.totalorder %v459_v40, 1  ;;  %v472_v47 = vrot.slane %v1458_v41, 7  ;;  %s413_s25 = sadd.s32 %s1329_s21, %s1622_s16  ;;  %v979_v61 = vld [vmem:[%s1601_s5 + $0x140] sm:$0xff]  ;;  %v977_v0 = vld [vmem:[%s1601_s5 + $0x130] sm:$0xff]  ;;  %v976_v2 = vld [vmem:[%s1601_s5 + $0x128] sm:$0xff]  ;;  %v476_v9 = vrot.slane %v1458_v41, 1 }
  0x1e   : > { %1057 = vmatpush3.msra.mxu0 %v963_v19  ;;  %1092 = vmatpush3.msra.mxu1 %v491_v21  ;;  %s950_s21 = sshll.u32 %s413_s25, 3  ;;  %v975_v5 = vld [vmem:[%s1601_s5 + $0x120] sm:$0xff]  ;;  %v974_v6 = vld [vmem:[%s1601_s5 + $0x118] sm:$0xff]  ;;  %v973_v8 = vld [vmem:[%s1601_s5 + $0x110] sm:$0xff] }
  0x1f   : > { %1058 = vmatprep.subr.mxu0 %v1229_v3  ;;  %1093 = vmatprep.subr.mxu1 %v1229_v3  ;;  %v457_v44 = vmax.f32 %v456_v37, 0.0  ;;  %s415_s22 = scalar_lea.vmem %s1598_s2, %s950_s21  ;;  %v972_v11 = vld [vmem:[%s1601_s5 + $0x108] sm:$0xff]  ;;  %v971_v12 = vld [vmem:[%s1601_s5 + $0x100] sm:$0xff] }
  0x20   : > { %1059 = vmatpush3.msra.mxu0 %v962_v24  ;;  %1094 = vmatpush3.msra.mxu1 %v490_v25  ;;  %v463_v57 = vld [vmem:[%s415_s22] sm:$0x1]  ;;  %s467_s16 = scalar_select %p385_p6, 1, 0 }
  0x21   : > { %1060 = vmatprep.subr.mxu0 %v1229_v3  ;;  %1095 = vmatprep.subr.mxu1 %v1229_v3  ;;  %v461_v49 = vsel %vm460_vm0, %v457_v44, 0.0  ;;  %v464_v60 = vmul.f32 %v463_v57, %v1372_v16 }
  0x22   : > { %1061 = vmatpush3.msra.mxu0 %v961_v28  ;;  %1096 = vmatpush3.msra.mxu1 %v489_v29  ;;  %v475_v51 = vsel %vm474_vm1, %v461_v49, %v472_v47  ;;  %v468_v1 = vstv %s467_s16 }
  0x23   : > { %1062 = vmatprep.subr.mxu0 %v1229_v3  ;;  %1097 = vmatprep.subr.mxu1 %v1229_v3  ;;  %v465_v63 = vadd.f32 %v464_v60, %v1395_v23  ;;  %vm469_vm3 = vcmp.eq.s32.totalorder %v468_v1, 1 }
  0x24   : > { %1063 = vmatpush3.msra.mxu0 %v960_v31  ;;  %1098 = vmatpush3.msra.mxu1 %v488_v32 }
  0x25   : > { %1064 = vmatprep.subr.mxu0 %v1229_v3  ;;  %1099 = vmatprep.subr.mxu1 %v1229_v3  ;;  %v466_v4 = vmax.f32 %v465_v63, 0.0 }
  0x26   : > { %1065 = vmatpush3.msra.mxu0 %v959_v35  ;;  %1100 = vmatpush3.msra.mxu1 %v487_v36 }
  0x27   : > { %1066 = vmatprep.subr.mxu0 %v1229_v3  ;;  %1101 = vmatprep.subr.mxu1 %v1229_v3  ;;  %v470_v7 = vsel %vm469_vm3, %v466_v4, 0.0 }
  0x28   : > { %1067 = vmatpush3.msra.mxu0 %v958_v38  ;;  %1102 = vmatpush3.msra.mxu1 %v486_v39  ;;  %v479_v10 = vrot.slane %v470_v7, 1 }
  0x29   : > { %1068 = vmatprep.subr.mxu0 %v1229_v3  ;;  %1103 = vmatprep.subr.mxu1 %v1229_v3 }
  0x2a   : > { %1069 = vmatpush3.msra.mxu0 %v957_v42  ;;  %1104 = vmatpush3.msra.mxu1 %v485_v43  ;;  %v482_v13 = vsel %vm481_vm4, %v476_v9, %v479_v10 }
  0x2b   : > { %1070 = vmatprep.subr.mxu0 %v1229_v3  ;;  %1105 = vmatprep.subr.mxu1 %v1229_v3 }
  0x2c   : > { %1071 = vmatpush3.msra.mxu0 %v956_v45  ;;  %1106 = vmatpush3.msra.mxu1 %v484_v46 }
  0x2d   : > { %1072 = vmatprep.subr.mxu0 %v1229_v3  ;;  %1074 = vmatprep.mubr.msk.f32.mxu0 %vm1230_vm2, %v1229_v3 }
  0x2e   : > { %1073 = vmatpush3.msra.mxu0 %v955_v48  ;;  %1107 = vmatprep.subr.mxu1 %v1229_v3 }
  0x2f   : > { %1075 = vmatmul.mubr.f32.vlgmr.msra.gmra.mxu0 %v1458_v41  ;;  %1108 = vmatpush3.msra.mxu1 %v483_v50 }
  0x30   : > { %1109 = vmatprep.mubr.msk.f32.mxu1 %vm1230_vm2, %v1229_v3  ;;  %1112 = vmatprep.subr.mxu0 %v1229_v3 }
  0x31   : > { %1110 = vmatmul.mubr.f32.vlgmr.msra.gmra.mxu1 %v475_v51  ;;  %1113 = vmatpush3.msra.mxu0 %v986_v52 }
  0x32   : > { %1114 = vmatprep.subr.mxu0 %v1229_v3  ;;  %1144 = vmatprep.mubr.msk.f32.mxu0 %vm1230_vm2, %v1229_v3 }
  0x33   : > { %1115 = vmatpush3.msra.mxu0 %v985_v53 }
  0x34   : > { %1116 = vmatprep.subr.mxu0 %v1229_v3 }
  0x35   : > { %1117 = vmatpush3.msra.mxu0 %v984_v54 }
  0x36   : > { %1118 = vmatprep.subr.mxu0 %v1229_v3 }
  0x37   : > { %1119 = vmatpush3.msra.mxu0 %v983_v55 }
  0x38   : > { %1120 = vmatprep.subr.mxu0 %v1229_v3 }
  0x39   : > { %1121 = vmatpush3.msra.mxu0 %v982_v56 }
  0x3a   : > { %1122 = vmatprep.subr.mxu0 %v1229_v3 }
  0x3b   : > { %1123 = vmatpush3.msra.mxu0 %v981_v58 }
  0x3c   : > { %1124 = vmatprep.subr.mxu0 %v1229_v3 }
  0x3d   : > { %1125 = vmatpush3.msra.mxu0 %v980_v59 }
  0x3e   : > { %1126 = vmatprep.subr.mxu0 %v1229_v3 }
  0x3f   : > { %1127 = vmatpush3.msra.mxu0 %v979_v61 }
  0x40   : > { %1128 = vmatprep.subr.mxu0 %v1229_v3 }
  0x41   : > { %1129 = vmatpush3.msra.mxu0 %v978_v62 }
  0x42   : > { %1130 = vmatprep.subr.mxu0 %v1229_v3 }
  0x43   : > { %1131 = vmatpush3.msra.mxu0 %v977_v0 }
  0x44   : > { %1132 = vmatprep.subr.mxu0 %v1229_v3 }
  0x45   : > { %1133 = vmatpush3.msra.mxu0 %v976_v2 }
  0x46   : > { %1134 = vmatprep.subr.mxu0 %v1229_v3 }
  0x47   : > { %1135 = vmatpush3.msra.mxu0 %v975_v5 }
  0x48   : > { %1136 = vmatprep.subr.mxu0 %v1229_v3 }
  0x49   : > { %1137 = vmatpush3.msra.mxu0 %v974_v6 }
  0x4a   : > { %1138 = vmatprep.subr.mxu0 %v1229_v3 }
  0x4b   : > { %1139 = vmatpush3.msra.mxu0 %v973_v8 }
  0x4c   : > { %1140 = vmatprep.subr.mxu0 %v1229_v3 }
  0x4d   : > { %1141 = vmatpush3.msra.mxu0 %v972_v11 }
  0x4e   : > { %1142 = vmatprep.subr.mxu0 %v1229_v3 }
  0x4f   : > { %1143 = vmatpush3.msra.mxu0 %v971_v12 }
  0x50   : > { %1145 = vmatmul.mubr.f32.vlgmr.msra.gmra.mxu0 %v482_v13 }
  0xef   : > { %v582_v14 = vpop.f32.mrf.mxu0 }
  0xf1   : > { %v652_v15 = vpop.f32.mrf.mxu1  ;;  %v1076_v16 = vpop.f32.mrf.mxu0 }
  0xf2   : > { %v653_v18 = vadd.f32 %v652_v15, %v582_v14 }
  0xf3   : > { %v1111_v17 = vpop.f32.mrf.mxu1 }
 0x110   : > { %v739_v19 = vpop.f32.mrf.mxu0 }
 0x111   : > { %v743_v20 = vadd.f32 %v739_v19, %v653_v18 }
 0x112   : > { %v1146_v21 = vpop.f32.mrf.mxu0 }
 0x113   : > { %744 = vst [vmem:[%s426_s18] sm:$0xff] %v743_v20  ;;  %v745_v22 = vrot.slane %v743_v20, 4  ;;  %v751_v23 = vmul.f32 %v743_v20, %v743_v20 }
 0x115   : > { %v746_v3 = vadd.f32 %v745_v22, %v743_v20  ;;  %v752_v24 = vrot.slane %v751_v23, 4 }
 0x117   : > { %v747_v25 = vrot.slane %v746_v3, 2  ;;  %v753_v26 = vadd.f32 %v752_v24, %v751_v23 }
 0x119   : > { %v748_v27 = vadd.f32 %v747_v25, %v746_v3  ;;  %v754_v28 = vrot.slane %v753_v26, 2 }
 0x11b   : > { %v749_v29 = vrot.slane %v748_v27, 1  ;;  %v755_v30 = vadd.f32 %v754_v28, %v753_v26 }
 0x11d   : > { %v756_v31 = vrot.slane %v755_v30, 1  ;;  %v750_v32 = vadd.f32 %v749_v29, %v748_v27 }
 0x11f   : > { %v757_v33 = vadd.f32 %v756_v31, %v755_v30 }
 0x121   : > { %v758_v34 = vsel %vm474_vm1, %v750_v32, %v757_v33 }
 0x122   : > { %759 = vst [vmem:[%s434_s15] sm:$0x3] %v758_v34 }
 0x123 PF: > { %s18_s28 = sadd.s32 1, %s1227_s28   ;;  %s1605_s24 = smov %s1219_s26 }
 0x124   : > { %p15_p11 = scmp.ge.s32.totalorder %s18_s28, 6   ;;  %s1606_s25 = smov %s1223_s27 }
 0x125   : > { %s1607_s26 = smov %s1610_s29  ;;  %s1608_s27 = smov %s1614_s30 }
 0x126   :  { %17 = sbr.rel (!%p15_p11) target bundleno = 3 (0x3), region = 94 }

// kernel: basic_block_forward.5
= control target key start
LH: loop header
LB: loop body
LE: loop exit
PB: predicated region body
PF: predicated region fallthrough
CT: control target
= control target key end

     0   :  { %s320_s15 = smov 0   ;;  %s364_s0 = inlined_call_operand.vmem [shape: f32[32,128], index: 0, kind: input, shape index: {}]   ;;  %s365_s1 = inlined_call_operand.vmem [shape: f32[32,128], index: 1, kind: input, shape index: {}]   ;;  %s366_s2 = inlined_call_operand.vmem [shape: f32[1,128], index: 2, kind: input, shape index: {}]   ;;  %s367_s3 = inlined_call_operand.vmem [shape: f32[1,128], index: 3, kind: input, shape index: {}]   ;;  %s368_s4 = inlined_call_operand.vmem [shape: f32[32,128], index: 4, kind: output, shape index: {}]  }
   0x1 LB: > { %s296_s16 = sadd.s32 4294967295, %s322_s15   ;;  %p300_p0 = scmp.ge.s32.totalorder %s322_s15, 1  ;;  %s322_s15 = sphi %s320_s15, %s14_s15  }
   0x2   : > { %p170_p1 = scmp.lt.s32.totalorder %s322_s15, 5 }
   0x4   : > { %p171_p2 = pnand %p300_p0, %p170_p1 }
   0x5   : > { %p198_p3 = scmp.lt.s32.totalorder (!%p171_p2), %s296_s16, 3 }
   0x6   : > { %174 = sbr.rel (%p171_p2) target bundleno = 24 (0x18), region = 36 }
   0xb   : > { %s370_s16 = smov (!%p198_p3, %s296_s16), 3  ;;  %v304_v0 = vld [vmem:[%s366_s2] ss:$0 sm:$0xff] }
   0xc   : > { %s301_s17 = sshll.u32 %s370_s16, 3  ;;  %v305_v2 = vld [vmem:[%s367_s3] ss:$0 sm:$0xff] }
   0xd   : > { %s201_s22 = scalar_lea.vmem %s364_s0, %s301_s17  ;;  %s205_s25 = scalar_lea.vmem %s365_s1, %s301_s17 }
   0xe   : > { %v210_v1 = vld [vmem:[%s201_s22] sm:$0xff]  ;;  %s209_s30 = scalar_lea.vmem %s368_s4, %s301_s17 }
   0xf   : > { %v218_v3 = vmul.f32 %v304_v0, %v210_v1  ;;  %v227_v4 = vld [vmem:[%s205_s25] sm:$0xff] }
  0x11   : > { %v226_v5 = vadd.f32 %v305_v2, %v218_v3 }
  0x13   : > { %v228_v6 = vadd.f32 %v227_v4, %v226_v5 }
  0x15   : > { %v229_v7 = vmax.f32 %v228_v6, 0.0 }
  0x17   : > { %230 = vst [vmem:[%s209_s30] sm:$0xff] %v229_v7 }
  0x18 PF: > { %s14_s15 = sadd.s32 1, %s322_s15  }
  0x19   : > { %p11_p4 = scmp.ge.s32.totalorder %s14_s15, 6  }
  0x1b   :  { %13 = sbr.rel (!%p11_p4) target bundleno = 1 (0x1), region = 69 }

</bundles_post_ra>
